<compile_context>
chip_gen: v7x
topology: tpu7x:2x2x1
jax: 0.10.0
libtpu: 0.0.40
codegen_flags: <defaults>
</compile_context>

<pallas_src>
import math

import jax
import jax.numpy as jnp
from jax.experimental import pallas as pl

EPS = 1e-6


# ---------------------------------------------------------------------------
# Fused kernel: feature2concept (optional) + all hierarchy levels.
# Whole batch processed in one program; levels unrolled at trace time.
# ---------------------------------------------------------------------------
def _make_fused_kernel(B, N, D, slot_nums, include_f2c):
    n_levels = len(slot_nums)
    n_in = (3 if include_f2c else 1) + 7 * n_levels
    inv_sqrt_d = 1.0 / math.sqrt(float(D))

    def kernel(*refs):
        in_refs = refs[:n_in]
        out_refs = refs[n_in:]

        if include_f2c:
            x = in_refs[0][...]        # (B*N, Din_pad)  lane-dense padded raw features
            wc = in_refs[1][...]       # (Din_pad, D)    rows beyond 131 are zero
            bc = in_refs[2][...]       # (1, D)
            # feature2concept: one MXU dot over all B*N object rows.
            feats2d = jnp.dot(x, wc, preferred_element_type=jnp.float32) + bc
            lvl_base = 3
        else:
            feats2d = in_refs[0][...].reshape(B * N, D)   # (B*N, D)
            lvl_base = 1

        cur_n = N
        for lvl in range(n_levels):
            base = lvl_base + 7 * lvl
            wk_t = in_refs[base + 0][...]   # (D, M)  pre-transposed slot keys
            w1 = in_refs[base + 1][...]
            b1 = in_refs[base + 2][...]
            w2 = in_refs[base + 3][...]
            b2 = in_refs[base + 4][...]
            w3 = in_refs[base + 5][...]
            b3 = in_refs[base + 6][...]
            M = slot_nums[lvl]
            masks_ref, score_ref, feat_ref = out_refs[3 * lvl: 3 * lvl + 3]

            # HierarchyBuilder (approx): scaled dot-product slot logits, softmax
            # competition over slots. Batch is folded into the matmul rows.
            # NOTE: the reference-style "+ log(clip(input_scores))" term is a
            # per-object (per-row) constant and cancels exactly under the softmax
            # over slots, so it is omitted (no numerical change).
            logits = jnp.dot(feats2d, wk_t,
                             preferred_element_type=jnp.float32) * inv_sqrt_d  # (B*n, M)
            logits = logits - jnp.max(logits, axis=-1, keepdims=True)
            e = jnp.exp(logits)
            denom = jnp.sum(e, axis=-1, keepdims=True)
            masks2d = e * pl.reciprocal(denom, approx=True)                    # (B*n, M)

            # Per-batch (static unroll): score = max over objects (clamped),
            # feature = einsum('bmn,bnd->bmd') done as a trans_a MXU dot
            # (contract the object axis) — no materialized transpose.
            score_rows = []
            agg_rows = []
            for b in range(B):
                masks_b = masks2d[b * cur_n:(b + 1) * cur_n, :]    # (n, M)
                feats_b = feats2d[b * cur_n:(b + 1) * cur_n, :]    # (n, D)
                masks_ref[b] = masks_b.astype(masks_ref.dtype)     # emit (B, n, M)
                score_rows.append(jnp.max(masks_b, axis=0, keepdims=True))   # (1, M)
                agg_rows.append(jax.lax.dot_general(
                    masks_b, feats_b,
                    dimension_numbers=(((0,), (0,)), ((), ())),
                    preferred_element_type=jnp.float32))           # (M, D)

            score = jnp.clip(jnp.concatenate(score_rows, axis=0), EPS, 1.0 - EPS)  # (B, M)
            agg = jnp.concatenate(agg_rows, axis=0)                                # (B*M, D)

            # FCBlock(128, 2, D, D): Linear+ReLU, Linear+ReLU, Linear — batch folded
            # into rows so each layer is a single MXU dot for the whole batch.
            h = jnp.maximum(jnp.dot(agg, w1, preferred_element_type=jnp.float32) + b1, 0.0)
            h = jnp.maximum(jnp.dot(h, w2, preferred_element_type=jnp.float32) + b2, 0.0)
            out2d = jnp.dot(h, w3, preferred_element_type=jnp.float32) + b3        # (B*M, D)

            score_ref[...] = score.astype(score_ref.dtype)
            feat_ref[...] = out2d.reshape(B, M, D).astype(feat_ref.dtype)

            # Next level consumes this level's features (scores cancel, see NOTE).
            feats2d = out2d
            cur_n = M

    return kernel


def _run_fused(x, params, slot_nums, include_f2c):
    """x: raw inputs (B, N, 131) if include_f2c else concept features (B, N, D)."""
    D = params["bc"].shape[-1]
    if include_f2c:
        B, N, raw_d = x.shape
        raw_pad = params["wc"].shape[0]
        x_in = x.reshape(B * N, raw_d)
        if raw_pad > raw_d:
            # Lane-dense padding; the matching weight rows are zero so results are identical.
            x_in = jnp.pad(x_in, ((0, 0), (0, raw_pad - raw_d)))
        flat_in = [x_in, params["wc"], params["bc"]]
    else:
        B, N, d_in = x.shape
        assert d_in == D, "build_scene expects concept-dim features"
        flat_in = [x]

    for lvl in params["levels"]:
        flat_in += [lvl["wk_t"], lvl["w1"], lvl["b1"],
                    lvl["w2"], lvl["b2"], lvl["w3"], lvl["b3"]]

    out_shapes = []
    cur_n = N
    for M in slot_nums:
        out_shapes.append(jax.ShapeDtypeStruct((B, cur_n, M), jnp.float32))  # masks (b, n, m)
        out_shapes.append(jax.ShapeDtypeStruct((B, M), jnp.float32))         # scores
        out_shapes.append(jax.ShapeDtypeStruct((B, M, D), jnp.float32))      # features
        cur_n = M

    kernel = _make_fused_kernel(B, N, D, tuple(slot_nums), include_f2c)
    # No grid / BlockSpecs: whole arrays are VMEM-resident (total footprint << 1 MiB),
    # single program, no per-call-per-level or per-grid-step pipeline overhead.
    outs = pl.pallas_call(kernel, out_shape=tuple(out_shapes))(*flat_in)

    scores, features, connections = [], [], []
    for lvl in range(len(slot_nums)):
        masks_bnm, score, feature = outs[3 * lvl: 3 * lvl + 3]
        connections.append(jnp.swapaxes(masks_bnm, 1, 2))   # (B, M, n) torch layout
        scores.append(score)                                 # (B, M)
        features.append(feature)                             # (B, M, D)
    return {"scores": scores, "features": features, "connections": connections}


# ---------------------------------------------------------------------------
# Deterministic parameter construction (PyTorch nn.Linear default init style).
# ---------------------------------------------------------------------------
def _linear_init(key, fan_in, fan_out):
    kw, kb = jax.random.split(key)
    bound = 1.0 / math.sqrt(fan_in)
    w = jax.random.uniform(kw, (fan_in, fan_out), jnp.float32, -bound, bound)
    b = jax.random.uniform(kb, (1, fan_out), jnp.float32, -bound, bound)
    return w, b


class SceneLearnerPallas:
    def __init__(self, concept_dim, hierarchy_construct, raw_feat_dim=131,
                 hidden=128, seed=0):
        self.concept_dim = concept_dim
        self.hierarchy_construct = tuple(hierarchy_construct)
        key = jax.random.PRNGKey(seed)
        keys = jax.random.split(key, 1 + 4 * len(self.hierarchy_construct))

        # feature2concept = nn.Linear(131, concept_dim); weight rows zero-padded to a
        # lane-dense (multiple-of-128) input dim so kernel loads are unmasked.
        wc, bc = _linear_init(keys[0], raw_feat_dim, concept_dim)
        raw_pad = ((raw_feat_dim + 127) // 128) * 128
        wc_pad = jnp.zeros((raw_pad, concept_dim), jnp.float32).at[:raw_feat_dim, :].set(wc)

        # per-level HierarchyBuilder slot keys (stored pre-transposed) +
        # FCBlock(128, 2, D, D) weights.
        levels = []
        for i, slot_num in enumerate(self.hierarchy_construct):
            k0, k1, k2, k3 = keys[1 + 4 * i: 5 + 4 * i]
            wk = jax.random.normal(k0, (slot_num, concept_dim), jnp.float32)
            w1, b1 = _linear_init(k1, concept_dim, hidden)
            w2, b2 = _linear_init(k2, hidden, hidden)
            w3, b3 = _linear_init(k3, hidden, concept_dim)
            levels.append(dict(wk_t=jnp.transpose(wk),   # (D, M) pre-transposed
                               w1=w1, b1=b1, w2=w2, b2=b2, w3=w3, b3=b3))

        self.params = {"wc": wc_pad, "bc": bc, "levels": levels}

        # jit the wrappers so the padding / reshape / transpose plumbing fuses.
        self._forward_jit = jax.jit(
            lambda x: _run_fused(x, self.params, self.hierarchy_construct, True))
        self._build_scene_jit = jax.jit(
            lambda f: _run_fused(f, self.params, self.hierarchy_construct, False))

    def build_scene(self, input_features):
        """input_features: (B, N, D) -> dict of per-level scores/features/connections."""
        return self._build_scene_jit(input_features)

    def forward(self, inputs):
        # TODO(synk): the reference forward only calls self.scene_perception(inputs)
        # (external backbone). Here we run the module's own tensor path instead:
        # feature2concept projection followed by build_scene, all in one fused kernel.
        return self._forward_jit(inputs)


if __name__ == "__main__":
    B, N, RAW_D = 2, 8, 131
    CONCEPT_DIM = 32
    HIERARCHY = (4, 2)

    model = SceneLearnerPallas(CONCEPT_DIM, HIERARCHY, raw_feat_dim=RAW_D, seed=0)

    key = jax.random.PRNGKey(0)
    inputs = jax.random.normal(key, (B, N, RAW_D), jnp.float32)

    out = model.forward(inputs)
    out = jax.block_until_ready(out)

    # shape + sanity checks (forward path)
    assert out["connections"][0].shape == (B, HIERARCHY[0], N)
    assert out["features"][0].shape == (B, HIERARCHY[0], CONCEPT_DIM)
    assert out["scores"][0].shape == (B, HIERARCHY[0])
    assert out["connections"][1].shape == (B, HIERARCHY[1], HIERARCHY[0])
    assert out["features"][1].shape == (B, HIERARCHY[1], CONCEPT_DIM)
    assert out["scores"][1].shape == (B, HIERARCHY[1])
    for lvl in range(len(HIERARCHY)):
        assert bool(jnp.all(jnp.isfinite(out["features"][lvl])))
        assert bool(jnp.all(out["scores"][lvl] >= EPS))
        assert bool(jnp.all(out["scores"][lvl] <= 1.0 - EPS))

    # exercise the build_scene entry point directly (concept-dim features in)
    feats = jax.random.normal(jax.random.PRNGKey(1), (B, N, CONCEPT_DIM), jnp.float32)
    scene = jax.block_until_ready(model.build_scene(feats))
    assert scene["connections"][0].shape == (B, HIERARCHY[0], N)
    assert scene["features"][1].shape == (B, HIERARCHY[1], CONCEPT_DIM)

    print("KERNEL_OK")
</pallas_src>

<mosaic_0001>
module attributes {stable_mosaic.version = 11 : i64} {
  func.func @kernel(%arg0: memref<16x256xf32, #tpu.memory_space<vmem>>, %arg1: memref<256x32xf32, #tpu.memory_space<vmem>>, %arg2: memref<1x32xf32, #tpu.memory_space<vmem>>, %arg3: memref<32x4xf32, #tpu.memory_space<vmem>>, %arg4: memref<32x128xf32, #tpu.memory_space<vmem>>, %arg5: memref<1x128xf32, #tpu.memory_space<vmem>>, %arg6: memref<128x128xf32, #tpu.memory_space<vmem>>, %arg7: memref<1x128xf32, #tpu.memory_space<vmem>>, %arg8: memref<128x32xf32, #tpu.memory_space<vmem>>, %arg9: memref<1x32xf32, #tpu.memory_space<vmem>>, %arg10: memref<32x2xf32, #tpu.memory_space<vmem>>, %arg11: memref<32x128xf32, #tpu.memory_space<vmem>>, %arg12: memref<1x128xf32, #tpu.memory_space<vmem>>, %arg13: memref<128x128xf32, #tpu.memory_space<vmem>>, %arg14: memref<1x128xf32, #tpu.memory_space<vmem>>, %arg15: memref<128x32xf32, #tpu.memory_space<vmem>>, %arg16: memref<1x32xf32, #tpu.memory_space<vmem>>, %arg17: memref<2x8x4xf32, #tpu.memory_space<vmem>>, %arg18: memref<2x4xf32, #tpu.memory_space<vmem>>, %arg19: memref<2x4x32xf32, #tpu.memory_space<vmem>>, %arg20: memref<2x4x2xf32, #tpu.memory_space<vmem>>, %arg21: memref<2x2xf32, #tpu.memory_space<vmem>>, %arg22: memref<2x2x32xf32, #tpu.memory_space<vmem>>) attributes {dimension_semantics = [], scalar_prefetch = 0 : i64, scratch_operands = 0 : i64, tpu.core_type = #tpu.core_type<tc>} {
    %c0 = arith.constant 0 : index
    %c0_0 = arith.constant 0 : index
    %0 = vector.load %arg0[%c0, %c0_0] : memref<16x256xf32, #tpu.memory_space<vmem>>, vector<16x256xf32>
    %c0_1 = arith.constant 0 : index
    %c0_2 = arith.constant 0 : index
    %1 = vector.load %arg1[%c0_1, %c0_2] : memref<256x32xf32, #tpu.memory_space<vmem>>, vector<256x32xf32>
    %c0_3 = arith.constant 0 : index
    %c0_4 = arith.constant 0 : index
    %2 = vector.load %arg2[%c0_3, %c0_4] : memref<1x32xf32, #tpu.memory_space<vmem>>, vector<1x32xf32>
    %cst = arith.constant dense<0.000000e+00> : vector<16x32xf32>
    %3 = tpu.matmul %0, %1, %cst {dimension_numbers = #tpu.dot_dimension_numbers<[1], [0], [0], [1], [0, 0, 1, 1], [], []>} : vector<16x256xf32>, vector<256x32xf32>, vector<16x32xf32> -> vector<16x32xf32>
    %4 = vector.broadcast %2 : vector<1x32xf32> to vector<16x32xf32>
    %5 = arith.addf %3, %4 : vector<16x32xf32>
    %c0_5 = arith.constant 0 : index
    %c0_6 = arith.constant 0 : index
    %6 = vector.load %arg3[%c0_5, %c0_6] : memref<32x4xf32, #tpu.memory_space<vmem>>, vector<32x4xf32>
    %c0_7 = arith.constant 0 : index
    %c0_8 = arith.constant 0 : index
    %7 = vector.load %arg4[%c0_7, %c0_8] : memref<32x128xf32, #tpu.memory_space<vmem>>, vector<32x128xf32>
    %c0_9 = arith.constant 0 : index
    %c0_10 = arith.constant 0 : index
    %8 = vector.load %arg5[%c0_9, %c0_10] : memref<1x128xf32, #tpu.memory_space<vmem>>, vector<1x128xf32>
    %c0_11 = arith.constant 0 : index
    %c0_12 = arith.constant 0 : index
    %9 = vector.load %arg6[%c0_11, %c0_12] : memref<128x128xf32, #tpu.memory_space<vmem>>, vector<128x128xf32>
    %c0_13 = arith.constant 0 : index
    %c0_14 = arith.constant 0 : index
    %10 = vector.load %arg7[%c0_13, %c0_14] : memref<1x128xf32, #tpu.memory_space<vmem>>, vector<1x128xf32>
    %c0_15 = arith.constant 0 : index
    %c0_16 = arith.constant 0 : index
    %11 = vector.load %arg8[%c0_15, %c0_16] : memref<128x32xf32, #tpu.memory_space<vmem>>, vector<128x32xf32>
    %c0_17 = arith.constant 0 : index
    %c0_18 = arith.constant 0 : index
    %12 = vector.load %arg9[%c0_17, %c0_18] : memref<1x32xf32, #tpu.memory_space<vmem>>, vector<1x32xf32>
    %cst_19 = arith.constant dense<0.000000e+00> : vector<16x4xf32>
    %13 = tpu.matmul %5, %6, %cst_19 {dimension_numbers = #tpu.dot_dimension_numbers<[1], [0], [0], [1], [0, 0, 1, 1], [], []>} : vector<16x32xf32>, vector<32x4xf32>, vector<16x4xf32> -> vector<16x4xf32>
    %cst_20 = arith.constant 0.176776692 : f32
    %14 = vector.broadcast %cst_20 : f32 to vector<16x4xf32>
    %15 = arith.mulf %13, %14 : vector<16x4xf32>
    %cst_21 = arith.constant dense<0xFF800000> : vector<16xf32>
    %16 = vector.multi_reduction <maximumf>, %15, %cst_21 [1] : vector<16x4xf32> to vector<16xf32>
    %17 = vector.shape_cast %16 : vector<16xf32> to vector<16x1xf32>
    %18 = vector.broadcast %17 : vector<16x1xf32> to vector<16x4xf32>
    %19 = arith.subf %15, %18 : vector<16x4xf32>
    %20 = math.exp %19 : vector<16x4xf32>
    %cst_22 = arith.constant dense<0.000000e+00> : vector<16xf32>
    %21 = vector.multi_reduction <add>, %20, %cst_22 [1] : vector<16x4xf32> to vector<16xf32>
    %22 = vector.shape_cast %21 : vector<16xf32> to vector<16x1xf32>
    %23 = tpu.reciprocal %22 {approx = true} : vector<16x1xf32> -> vector<16x1xf32>
    %24 = vector.broadcast %23 : vector<16x1xf32> to vector<16x4xf32>
    %25 = arith.mulf %20, %24 : vector<16x4xf32>
    %26 = vector.extract_strided_slice %25 {offsets = [0, 0], sizes = [8, 4], strides = [1, 1]} : vector<16x4xf32> to vector<8x4xf32>
    %27 = vector.extract_strided_slice %5 {offsets = [0, 0], sizes = [8, 32], strides = [1, 1]} : vector<16x32xf32> to vector<8x32xf32>
    %c0_23 = arith.constant 0 : index
    %c0_24 = arith.constant 0 : index
    %c0_25 = arith.constant 0 : index
    %28 = vector.load %arg17[%c0_23, %c0_24, %c0_25] : memref<2x8x4xf32, #tpu.memory_space<vmem>>, vector<1x8x4xf32>
    %29 = vector.shape_cast %28 : vector<1x8x4xf32> to vector<8x4xf32>
    %30 = vector.shape_cast %26 : vector<8x4xf32> to vector<1x8x4xf32>
    tpu.vector_store %arg17[%c0_23, %c0_24, %c0_25], %30 {strides = array<i32>} : memref<2x8x4xf32, #tpu.memory_space<vmem>>, vector<1x8x4xf32>,
    %cst_26 = arith.constant dense<0xFF800000> : vector<4xf32>
    %31 = vector.multi_reduction <maximumf>, %26, %cst_26 [0] : vector<8x4xf32> to vector<4xf32>
    %32 = vector.shape_cast %31 : vector<4xf32> to vector<1x4xf32>
    %cst_27 = arith.constant dense<0.000000e+00> : vector<4x32xf32>
    %33 = tpu.matmul %26, %27, %cst_27 {dimension_numbers = #tpu.dot_dimension_numbers<[0], [0], [1], [1], [0, 1, 1, 1], [], []>} : vector<8x4xf32>, vector<8x32xf32>, vector<4x32xf32> -> vector<4x32xf32>
    %34 = vector.extract_strided_slice %25 {offsets = [8, 0], sizes = [8, 4], strides = [1, 1]} : vector<16x4xf32> to vector<8x4xf32>
    %35 = vector.extract_strided_slice %5 {offsets = [8, 0], sizes = [8, 32], strides = [1, 1]} : vector<16x32xf32> to vector<8x32xf32>
    %c1 = arith.constant 1 : index
    %c0_28 = arith.constant 0 : index
    %c0_29 = arith.constant 0 : index
    %36 = vector.load %arg17[%c1, %c0_28, %c0_29] : memref<2x8x4xf32, #tpu.memory_space<vmem>>, vector<1x8x4xf32>
    %37 = vector.shape_cast %36 : vector<1x8x4xf32> to vector<8x4xf32>
    %38 = vector.shape_cast %34 : vector<8x4xf32> to vector<1x8x4xf32>
    tpu.vector_store %arg17[%c1, %c0_28, %c0_29], %38 {strides = array<i32>} : memref<2x8x4xf32, #tpu.memory_space<vmem>>, vector<1x8x4xf32>,
    %cst_30 = arith.constant dense<0xFF800000> : vector<4xf32>
    %39 = vector.multi_reduction <maximumf>, %34, %cst_30 [0] : vector<8x4xf32> to vector<4xf32>
    %40 = vector.shape_cast %39 : vector<4xf32> to vector<1x4xf32>
    %cst_31 = arith.constant dense<0.000000e+00> : vector<4x32xf32>
    %41 = tpu.matmul %34, %35, %cst_31 {dimension_numbers = #tpu.dot_dimension_numbers<[0], [0], [1], [1], [0, 1, 1, 1], [], []>} : vector<8x4xf32>, vector<8x32xf32>, vector<4x32xf32> -> vector<4x32xf32>
    %42 = tpu.concatenate %32, %40 in 0 : vector<1x4xf32>, vector<1x4xf32> -> vector<2x4xf32>
    %cst_32 = arith.constant 9.99999997E-7 : f32
    %cst_33 = arith.constant 0.999998986 : f32
    %43 = vector.broadcast %cst_32 : f32 to vector<2x4xf32>
    %44 = arith.maximumf %43, %42 : vector<2x4xf32>
    %45 = vector.broadcast %cst_33 : f32 to vector<2x4xf32>
    %46 = arith.minimumf %45, %44 : vector<2x4xf32>
    %47 = tpu.concatenate %33, %41 in 0 : vector<4x32xf32>, vector<4x32xf32> -> vector<8x32xf32>
    %cst_34 = arith.constant dense<0.000000e+00> : vector<8x128xf32>
    %48 = tpu.matmul %47, %7, %cst_34 {dimension_numbers = #tpu.dot_dimension_numbers<[1], [0], [0], [1], [0, 0, 1, 1], [], []>} : vector<8x32xf32>, vector<32x128xf32>, vector<8x128xf32> -> vector<8x128xf32>
    %49 = vector.broadcast %8 : vector<1x128xf32> to vector<8x128xf32>
    %50 = arith.addf %48, %49 : vector<8x128xf32>
    %cst_35 = arith.constant 0.000000e+00 : f32
    %51 = vector.broadcast %cst_35 : f32 to vector<8x128xf32>
    %52 = arith.maximumf %50, %51 : vector<8x128xf32>
    %cst_36 = arith.constant dense<0.000000e+00> : vector<8x128xf32>
    %53 = tpu.matmul %52, %9, %cst_36 {dimension_numbers = #tpu.dot_dimension_numbers<[1], [0], [0], [1], [0, 0, 1, 1], [], []>} : vector<8x128xf32>, vector<128x128xf32>, vector<8x128xf32> -> vector<8x128xf32>
    %54 = vector.broadcast %10 : vector<1x128xf32> to vector<8x128xf32>
    %55 = arith.addf %53, %54 : vector<8x128xf32>
    %cst_37 = arith.constant 0.000000e+00 : f32
    %56 = vector.broadcast %cst_37 : f32 to vector<8x128xf32>
    %57 = arith.maximumf %55, %56 : vector<8x128xf32>
    %cst_38 = arith.constant dense<0.000000e+00> : vector<8x32xf32>
    %58 = tpu.matmul %57, %11, %cst_38 {dimension_numbers = #tpu.dot_dimension_numbers<[1], [0], [0], [1], [0, 0, 1, 1], [], []>} : vector<8x128xf32>, vector<128x32xf32>, vector<8x32xf32> -> vector<8x32xf32>
    %59 = vector.broadcast %12 : vector<1x32xf32> to vector<8x32xf32>
    %60 = arith.addf %58, %59 : vector<8x32xf32>
    %c0_39 = arith.constant 0 : index
    %c0_40 = arith.constant 0 : index
    %61 = vector.load %arg18[%c0_39, %c0_40] : memref<2x4xf32, #tpu.memory_space<vmem>>, vector<2x4xf32>
    tpu.vector_store %arg18[%c0_39, %c0_40], %46 {strides = array<i32>} : memref<2x4xf32, #tpu.memory_space<vmem>>, vector<2x4xf32>,
    %62 = vector.shape_cast %60 : vector<8x32xf32> to vector<2x4x32xf32>
    %c0_41 = arith.constant 0 : index
    %c0_42 = arith.constant 0 : index
    %c0_43 = arith.constant 0 : index
    %63 = vector.load %arg19[%c0_41, %c0_42, %c0_43] : memref<2x4x32xf32, #tpu.memory_space<vmem>>, vector<2x4x32xf32>
    tpu.vector_store %arg19[%c0_41, %c0_42, %c0_43], %62 {strides = array<i32>} : memref<2x4x32xf32, #tpu.memory_space<vmem>>, vector<2x4x32xf32>,
    %c0_44 = arith.constant 0 : index
    %c0_45 = arith.constant 0 : index
    %64 = vector.load %arg10[%c0_44, %c0_45] : memref<32x2xf32, #tpu.memory_space<vmem>>, vector<32x2xf32>
    %c0_46 = arith.constant 0 : index
    %c0_47 = arith.constant 0 : index
    %65 = vector.load %arg11[%c0_46, %c0_47] : memref<32x128xf32, #tpu.memory_space<vmem>>, vector<32x128xf32>
    %c0_48 = arith.constant 0 : index
    %c0_49 = arith.constant 0 : index
    %66 = vector.load %arg12[%c0_48, %c0_49] : memref<1x128xf32, #tpu.memory_space<vmem>>, vector<1x128xf32>
    %c0_50 = arith.constant 0 : index
    %c0_51 = arith.constant 0 : index
    %67 = vector.load %arg13[%c0_50, %c0_51] : memref<128x128xf32, #tpu.memory_space<vmem>>, vector<128x128xf32>
    %c0_52 = arith.constant 0 : index
    %c0_53 = arith.constant 0 : index
    %68 = vector.load %arg14[%c0_52, %c0_53] : memref<1x128xf32, #tpu.memory_space<vmem>>, vector<1x128xf32>
    %c0_54 = arith.constant 0 : index
    %c0_55 = arith.constant 0 : index
    %69 = vector.load %arg15[%c0_54, %c0_55] : memref<128x32xf32, #tpu.memory_space<vmem>>, vector<128x32xf32>
    %c0_56 = arith.constant 0 : index
    %c0_57 = arith.constant 0 : index
    %70 = vector.load %arg16[%c0_56, %c0_57] : memref<1x32xf32, #tpu.memory_space<vmem>>, vector<1x32xf32>
    %cst_58 = arith.constant dense<0.000000e+00> : vector<8x2xf32>
    %71 = tpu.matmul %60, %64, %cst_58 {dimension_numbers = #tpu.dot_dimension_numbers<[1], [0], [0], [1], [0, 0, 1, 1], [], []>} : vector<8x32xf32>, vector<32x2xf32>, vector<8x2xf32> -> vector<8x2xf32>
    %cst_59 = arith.constant 0.176776692 : f32
    %72 = vector.broadcast %cst_59 : f32 to vector<8x2xf32>
    %73 = arith.mulf %71, %72 : vector<8x2xf32>
    %cst_60 = arith.constant dense<0xFF800000> : vector<8xf32>
    %74 = vector.multi_reduction <maximumf>, %73, %cst_60 [1] : vector<8x2xf32> to vector<8xf32>
    %75 = vector.shape_cast %74 : vector<8xf32> to vector<8x1xf32>
    %76 = vector.broadcast %75 : vector<8x1xf32> to vector<8x2xf32>
    %77 = arith.subf %73, %76 : vector<8x2xf32>
    %78 = math.exp %77 : vector<8x2xf32>
    %cst_61 = arith.constant dense<0.000000e+00> : vector<8xf32>
    %79 = vector.multi_reduction <add>, %78, %cst_61 [1] : vector<8x2xf32> to vector<8xf32>
    %80 = vector.shape_cast %79 : vector<8xf32> to vector<8x1xf32>
    %81 = tpu.reciprocal %80 {approx = true} : vector<8x1xf32> -> vector<8x1xf32>
    %82 = vector.broadcast %81 : vector<8x1xf32> to vector<8x2xf32>
    %83 = arith.mulf %78, %82 : vector<8x2xf32>
    %84 = vector.extract_strided_slice %83 {offsets = [0, 0], sizes = [4, 2], strides = [1, 1]} : vector<8x2xf32> to vector<4x2xf32>
    %85 = vector.extract_strided_slice %60 {offsets = [0, 0], sizes = [4, 32], strides = [1, 1]} : vector<8x32xf32> to vector<4x32xf32>
    %c0_62 = arith.constant 0 : index
    %c0_63 = arith.constant 0 : index
    %c0_64 = arith.constant 0 : index
    %86 = vector.load %arg20[%c0_62, %c0_63, %c0_64] : memref<2x4x2xf32, #tpu.memory_space<vmem>>, vector<1x4x2xf32>
    %87 = vector.shape_cast %86 : vector<1x4x2xf32> to vector<4x2xf32>
    %88 = vector.shape_cast %84 : vector<4x2xf32> to vector<1x4x2xf32>
    tpu.vector_store %arg20[%c0_62, %c0_63, %c0_64], %88 {strides = array<i32>} : memref<2x4x2xf32, #tpu.memory_space<vmem>>, vector<1x4x2xf32>,
    %cst_65 = arith.constant dense<0xFF800000> : vector<2xf32>
    %89 = vector.multi_reduction <maximumf>, %84, %cst_65 [0] : vector<4x2xf32> to vector<2xf32>
    %90 = vector.shape_cast %89 : vector<2xf32> to vector<1x2xf32>
    %cst_66 = arith.constant dense<0.000000e+00> : vector<2x32xf32>
    %91 = tpu.matmul %84, %85, %cst_66 {dimension_numbers = #tpu.dot_dimension_numbers<[0], [0], [1], [1], [0, 1, 1, 1], [], []>} : vector<4x2xf32>, vector<4x32xf32>, vector<2x32xf32> -> vector<2x32xf32>
    %92 = vector.extract_strided_slice %83 {offsets = [4, 0], sizes = [4, 2], strides = [1, 1]} : vector<8x2xf32> to vector<4x2xf32>
    %93 = vector.extract_strided_slice %60 {offsets = [4, 0], sizes = [4, 32], strides = [1, 1]} : vector<8x32xf32> to vector<4x32xf32>
    %c1_67 = arith.constant 1 : index
    %c0_68 = arith.constant 0 : index
    %c0_69 = arith.constant 0 : index
    %94 = vector.load %arg20[%c1_67, %c0_68, %c0_69] : memref<2x4x2xf32, #tpu.memory_space<vmem>>, vector<1x4x2xf32>
    %95 = vector.shape_cast %94 : vector<1x4x2xf32> to vector<4x2xf32>
    %96 = vector.shape_cast %92 : vector<4x2xf32> to vector<1x4x2xf32>
    tpu.vector_store %arg20[%c1_67, %c0_68, %c0_69], %96 {strides = array<i32>} : memref<2x4x2xf32, #tpu.memory_space<vmem>>, vector<1x4x2xf32>,
    %cst_70 = arith.constant dense<0xFF800000> : vector<2xf32>
    %97 = vector.multi_reduction <maximumf>, %92, %cst_70 [0] : vector<4x2xf32> to vector<2xf32>
    %98 = vector.shape_cast %97 : vector<2xf32> to vector<1x2xf32>
    %cst_71 = arith.constant dense<0.000000e+00> : vector<2x32xf32>
    %99 = tpu.matmul %92, %93, %cst_71 {dimension_numbers = #tpu.dot_dimension_numbers<[0], [0], [1], [1], [0, 1, 1, 1], [], []>} : vector<4x2xf32>, vector<4x32xf32>, vector<2x32xf32> -> vector<2x32xf32>
    %100 = tpu.concatenate %90, %98 in 0 : vector<1x2xf32>, vector<1x2xf32> -> vector<2x2xf32>
    %cst_72 = arith.constant 9.99999997E-7 : f32
    %cst_73 = arith.constant 0.999998986 : f32
    %101 = vector.broadcast %cst_72 : f32 to vector<2x2xf32>
    %102 = arith.maximumf %101, %100 : vector<2x2xf32>
    %103 = vector.broadcast %cst_73 : f32 to vector<2x2xf32>
    %104 = arith.minimumf %103, %102 : vector<2x2xf32>
    %105 = tpu.concatenate %91, %99 in 0 : vector<2x32xf32>, vector<2x32xf32> -> vector<4x32xf32>
    %cst_74 = arith.constant dense<0.000000e+00> : vector<4x128xf32>
    %106 = tpu.matmul %105, %65, %cst_74 {dimension_numbers = #tpu.dot_dimension_numbers<[1], [0], [0], [1], [0, 0, 1, 1], [], []>} : vector<4x32xf32>, vector<32x128xf32>, vector<4x128xf32> -> vector<4x128xf32>
    %107 = vector.broadcast %66 : vector<1x128xf32> to vector<4x128xf32>
    %108 = arith.addf %106, %107 : vector<4x128xf32>
    %cst_75 = arith.constant 0.000000e+00 : f32
    %109 = vector.broadcast %cst_75 : f32 to vector<4x128xf32>
    %110 = arith.maximumf %108, %109 : vector<4x128xf32>
    %cst_76 = arith.constant dense<0.000000e+00> : vector<4x128xf32>
    %111 = tpu.matmul %110, %67, %cst_76 {dimension_numbers = #tpu.dot_dimension_numbers<[1], [0], [0], [1], [0, 0, 1, 1], [], []>} : vector<4x128xf32>, vector<128x128xf32>, vector<4x128xf32> -> vector<4x128xf32>
    %112 = vector.broadcast %68 : vector<1x128xf32> to vector<4x128xf32>
    %113 = arith.addf %111, %112 : vector<4x128xf32>
    %cst_77 = arith.constant 0.000000e+00 : f32
    %114 = vector.broadcast %cst_77 : f32 to vector<4x128xf32>
    %115 = arith.maximumf %113, %114 : vector<4x128xf32>
    %cst_78 = arith.constant dense<0.000000e+00> : vector<4x32xf32>
    %116 = tpu.matmul %115, %69, %cst_78 {dimension_numbers = #tpu.dot_dimension_numbers<[1], [0], [0], [1], [0, 0, 1, 1], [], []>} : vector<4x128xf32>, vector<128x32xf32>, vector<4x32xf32> -> vector<4x32xf32>
    %117 = vector.broadcast %70 : vector<1x32xf32> to vector<4x32xf32>
    %118 = arith.addf %116, %117 : vector<4x32xf32>
    %c0_79 = arith.constant 0 : index
    %c0_80 = arith.constant 0 : index
    %119 = vector.load %arg21[%c0_79, %c0_80] : memref<2x2xf32, #tpu.memory_space<vmem>>, vector<2x2xf32>
    tpu.vector_store %arg21[%c0_79, %c0_80], %104 {strides = array<i32>} : memref<2x2xf32, #tpu.memory_space<vmem>>, vector<2x2xf32>,
    %120 = vector.shape_cast %118 : vector<4x32xf32> to vector<2x2x32xf32>
    %c0_81 = arith.constant 0 : index
    %c0_82 = arith.constant 0 : index
    %c0_83 = arith.constant 0 : index
    %121 = vector.load %arg22[%c0_81, %c0_82, %c0_83] : memref<2x2x32xf32, #tpu.memory_space<vmem>>, vector<2x2x32xf32>
    tpu.vector_store %arg22[%c0_81, %c0_82, %c0_83], %120 {strides = array<i32>} : memref<2x2x32xf32, #tpu.memory_space<vmem>>, vector<2x2x32xf32>,
    return
  }
}

</mosaic_0001>

<bundles_post_ra>
// kernel: _lambda_.1
= control target key start
LH: loop header
LB: loop body
LE: loop exit
PB: predicated region body
PF: predicated region fallthrough
CT: control target
= control target key end

     0   :  { %s2868_s0 = inlined_call_operand.vmem [shape: f32[16,256], index: 0, kind: input, shape index: {}]   ;;  %s2869_s1 = inlined_call_operand.hbm [shape: f32[256,32], index: 1, kind: input, shape index: {}]   ;;  %s2870_s2 = inlined_call_operand.vmem [shape: f32[1,32], index: 2, kind: input, shape index: {}]   ;;  %s2871_s3 = inlined_call_operand.hbm [shape: f32[32,4], index: 3, kind: input, shape index: {}]   ;;  %s2872_s4 = inlined_call_operand.hbm [shape: f32[32,128], index: 4, kind: input, shape index: {}]   ;;  %s2873_s5 = inlined_call_operand.vmem [shape: f32[1,128], index: 5, kind: input, shape index: {}]   ;;  %s2874_s6 = inlined_call_operand.hbm [shape: f32[128,128], index: 6, kind: input, shape index: {}]   ;;  %s2875_s7 = inlined_call_operand.vmem [shape: f32[1,128], index: 7, kind: input, shape index: {}]   ;;  %s2876_s8 = inlined_call_operand.hbm [shape: f32[128,32], index: 8, kind: input, shape index: {}]   ;;  %s2877_s9 = inlined_call_operand.vmem [shape: f32[1,32], index: 9, kind: input, shape index: {}]   ;;  %s2878_s10 = inlined_call_operand.vmem [shape: f32[32,2], index: 10, kind: input, shape index: {}]   ;;  %s2879_s11 = inlined_call_operand.vmem [shape: f32[32,128], index: 11, kind: input, shape index: {}]   ;;  %s2880_s12 = inlined_call_operand.vmem [shape: f32[1,128], index: 12, kind: input, shape index: {}]   ;;  %s2881_s13 = inlined_call_operand.hbm [shape: f32[128,128], index: 13, kind: input, shape index: {}]   ;;  %s2882_s14 = inlined_call_operand.vmem [shape: f32[1,128], index: 14, kind: input, shape index: {}]   ;;  %s2883_s15 = inlined_call_operand.hbm [shape: f32[128,32], index: 15, kind: input, shape index: {}]   ;;  %s2884_s16 = inlined_call_operand.vmem [shape: f32[1,32], index: 16, kind: input, shape index: {}]   ;;  %s2885_s17 = inlined_call_operand.vmem [shape: f32[2,8,4], index: 17, kind: output, shape index: {0}]   ;;  %s2886_s18 = inlined_call_operand.hbm [shape: f32[2,4], index: 18, kind: output, shape index: {1}]   ;;  %s2887_s19 = inlined_call_operand.hbm [shape: f32[2,4,32], index: 19, kind: output, shape index: {2}]   ;;  %s2888_s20 = inlined_call_operand.vmem [shape: f32[2,4,2], index: 20, kind: output, shape index: {3}]   ;;  %s2889_s21 = inlined_call_operand.hbm [shape: f32[2,2], index: 21, kind: output, shape index: {4}]   ;;  %s2890_s22 = inlined_call_operand.hbm [shape: f32[2,2,32], index: 22, kind: output, shape index: {5}]  }
   0x1   :  { %2897 = sst [smem:[#allocation27_spill]] %s2868_s0 }
   0x2   :  { %2898 = sst [smem:[#allocation28_spill]] %s2869_s1 }
   0x3   :  { %2899 = sst [smem:[#allocation29_spill]] %s2870_s2 }
   0x4   :  { %2900 = sst [smem:[#allocation30_spill]] %s2871_s3 }
   0x5   :  { %2901 = sst [smem:[#allocation31_spill]] %s2872_s4 }
   0x6   :  { %2902 = sst [smem:[#allocation32_spill]] %s2873_s5 }
   0x7   :  { %2903 = sst [smem:[#allocation33_spill]] %s2874_s6 }
   0x8   :  { %2904 = sst [smem:[#allocation34_spill]] %s2884_s16 }
   0x9   :  { %2905 = sst [smem:[#allocation35_spill]] %s2890_s22 }
   0xa   :  { %28 = vsyncpa [#allocation3], 0 }
   0xb   :  { %29 = vsyncpa [#allocation6], 0 }
   0xc   :  { %30 = vsyncpa [#allocation9], 0 }
   0xd   :  { %31 = vsyncpa [#allocation12], 0 }
   0xe   :  { %32 = vsyncpa [#allocation4], 0 }
   0xf   :  { %33 = vsyncpa [#allocation16], 0 }
  0x10   :  { %34 = vsyncpa [#allocation19], 0  ;;  %s2401_s3 = smov [#allocation5]   ;;  %s2402_s29 = smov [#allocation8]  }
  0x11   :  { %s56_s28 = sshll.u32 %s2401_s3, 4  ;;  %s82_s30 = sshll.u32 %s2402_s29, 4  ;;  %s57_s28 = int_to_ptr.vmem [resolvable:$true] %s56_s28  ;;  %s2537_s30 = int_to_ptr.vmem [resolvable:$true] %s82_s30 }
  0x12   :  { %s2906_s23 = sld [smem:[#allocation30_spill]] }
  0x18   :  { %s2145_s1 = scalar_lea.hbm %s2906_s23, 512 }
  0x19   :  { %p2146_p0 = scmp.ne.s32.totalorder %s2906_s23, %s2145_s1  ;;  %p2149_p1 = scmp.lt.u32.totalorder %s2145_s1, %s2906_s23 }
  0x1b   :  { %p2151_p2 = pnand %p2149_p1, %p2146_p0 }
  0x1d   :  { %2154 = shalt.err (!%p2151_p2)
}
  0x1e   :  { %s2155_s26 = scalar_lea.vmem %s57_s28, 512  ;;  %p2160_p4 = scmp.lt.s32.totalorder %s57_s28, %s57_s28 }
  0x1f   :  { %p2156_p3 = scmp.ne.s32.totalorder %s57_s28, %s2155_s26  ;;  %p2161_p5 = scmp.lt.s32.totalorder %s2155_s26, %s2155_s26 }
  0x21   :  { %p2162_p6 = por %p2161_p5, %p2160_p4 }
  0x23   :  { %p2163_p7 = pnand %p2162_p6, %p2156_p3 }
  0x25   :  { %2166 = shalt.err (!%p2163_p7)
}
  0x26   :  { %s2403_s2 = smov 128   ;;  %s2404_s27 = smov 8  }
  0x27   :  { %62 = dma.hbm_to_vmem [thread:$0]  %s2906_s23, 512, %s57_s28, [#allocation6], %s2403_s2, %s2403_s2, %s2404_s27  }
  0x28   :  { %s2907_s1 = sld [smem:[#allocation33_spill]] }
  0x2e   :  { %s2167_s5 = scalar_lea.hbm %s2907_s1, 2048 }
  0x2f   :  { %p2168_p8 = scmp.ne.s32.totalorder %s2907_s1, %s2167_s5  ;;  %p2171_p9 = scmp.lt.u32.totalorder %s2167_s5, %s2907_s1 }
  0x31   :  { %p2173_p10 = pnand %p2171_p9, %p2168_p8 }
  0x33   :  { %2176 = shalt.err (!%p2173_p10)
}
  0x34   :  { %s2177_s22 = scalar_lea.vmem %s2537_s30, 2048  ;;  %p2182_p12 = scmp.lt.s32.totalorder %s2537_s30, %s2537_s30 }
  0x35   :  { %p2178_p11 = scmp.ne.s32.totalorder %s2537_s30, %s2177_s22  ;;  %p2183_p13 = scmp.lt.s32.totalorder %s2177_s22, %s2177_s22 }
  0x37   :  { %p2184_p0 = por %p2183_p13, %p2182_p12 }
  0x39   :  { %p2185_p1 = pnand %p2184_p0, %p2178_p11 }
  0x3b   :  { %2188 = shalt.err (!%p2185_p1)
}
  0x3c   :  { %88 = dma.hbm_to_vmem [thread:$0]  %s2907_s1, 2048, %s2537_s30, [#allocation9], %s2403_s2, %s2403_s2, %s2404_s27  }
  0x3d   :  { %s2405_s3 = smov [#allocation11]   ;;  %s2406_s4 = smov [#allocation2]  }
  0x3e   :  { %s116_s29 = sshll.u32 %s2405_s3, 4  ;;  %s42_s0 = sshll.u32 %s2406_s4, 4  ;;  %s117_s29 = int_to_ptr.vmem [resolvable:$true] %s116_s29  ;;  %s2574_s0 = int_to_ptr.vmem [resolvable:$true] %s42_s0 }
  0x3f   :  { %s2189_s24 = scalar_lea.hbm %s2881_s13, 2048 }
  0x40   :  { %p2190_p2 = scmp.ne.s32.totalorder %s2881_s13, %s2189_s24  ;;  %p2193_p3 = scmp.lt.u32.totalorder %s2189_s24, %s2881_s13 }
  0x42   :  { %p2195_p4 = pnand %p2193_p3, %p2190_p2 }
  0x44   :  { %2198 = shalt.err (!%p2195_p4)
}
  0x45   :  { %s2199_s30 = scalar_lea.vmem %s117_s29, 2048  ;;  %p2204_p6 = scmp.lt.s32.totalorder %s117_s29, %s117_s29 }
  0x46   :  { %p2200_p5 = scmp.ne.s32.totalorder %s117_s29, %s2199_s30  ;;  %p2205_p7 = scmp.lt.s32.totalorder %s2199_s30, %s2199_s30 }
  0x48   :  { %p2206_p8 = por %p2205_p7, %p2204_p6 }
  0x4a   :  { %p2207_p9 = pnand %p2206_p8, %p2200_p5 }
  0x4c   :  { %2210 = shalt.err (!%p2207_p9)
}
  0x4d   :  { %122 = dma.hbm_to_vmem [thread:$0]  %s2881_s13, 2048, %s117_s29, [#allocation12], %s2403_s2, %s2403_s2, %s2404_s27  }
  0x4e   :  { %s2908_s16 = sld [smem:[#allocation28_spill]] }
  0x54   :  { %s2211_s4 = scalar_lea.hbm %s2908_s16, 4096 }
  0x55   :  { %p2212_p10 = scmp.ne.s32.totalorder %s2908_s16, %s2211_s4  ;;  %p2215_p11 = scmp.lt.u32.totalorder %s2211_s4, %s2908_s16 }
  0x57   :  { %p2217_p12 = pnand %p2215_p11, %p2212_p10 }
  0x59   :  { %2220 = shalt.err (!%p2217_p12)
}
  0x5a   :  { %s2221_s25 = scalar_lea.vmem %s2574_s0, 4096  ;;  %p2226_p0 = scmp.lt.s32.totalorder %s2574_s0, %s2574_s0 }
  0x5b   :  { %p2222_p13 = scmp.ne.s32.totalorder %s2574_s0, %s2221_s25  ;;  %p2227_p1 = scmp.lt.s32.totalorder %s2221_s25, %s2221_s25 }
  0x5d   :  { %p2228_p2 = por %p2227_p1, %p2226_p0 }
  0x5f   :  { %p2229_p3 = pnand %p2228_p2, %p2222_p13 }
  0x61   :  { %2232 = shalt.err (!%p2229_p3)
}
  0x62   :  { %48 = dma.hbm_to_vmem [thread:$0]  %s2908_s16, 4096, %s2574_s0, [#allocation3], %s2403_s2, %s2403_s2, %s2404_s27  }
  0x63   :  { %s2407_s26 = smov [#allocation7]   ;;  %s2408_s1 = smov [#allocation10]  }
  0x64   :  { %s68_s30 = sshll.u32 %s2407_s26, 4  ;;  %s96_s28 = sshll.u32 %s2408_s1, 4  ;;  %s69_s30 = int_to_ptr.vmem [resolvable:$true] %s68_s30  ;;  %s2611_s28 = int_to_ptr.vmem [resolvable:$true] %s96_s28 }
  0x65   :  { %s2909_s4 = sld [smem:[#allocation31_spill]] }
  0x6b   :  { %s2233_s5 = scalar_lea.hbm %s2909_s4, 512 }
  0x6c   :  { %p2234_p4 = scmp.ne.s32.totalorder %s2909_s4, %s2233_s5  ;;  %p2237_p5 = scmp.lt.u32.totalorder %s2233_s5, %s2909_s4 }
  0x6e   :  { %p2239_p6 = pnand %p2237_p5, %p2234_p4 }
  0x70   :  { %2242 = shalt.err (!%p2239_p6)
}
  0x71   :  { %s2243_s0 = scalar_lea.vmem %s69_s30, 512  ;;  %p2248_p8 = scmp.lt.s32.totalorder %s69_s30, %s69_s30 }
  0x72   :  { %p2244_p7 = scmp.ne.s32.totalorder %s69_s30, %s2243_s0  ;;  %p2249_p9 = scmp.lt.s32.totalorder %s2243_s0, %s2243_s0 }
  0x74   :  { %p2250_p10 = por %p2249_p9, %p2248_p8 }
  0x76   :  { %p2251_p11 = pnand %p2250_p10, %p2244_p7 }
  0x78   :  { %2254 = shalt.err (!%p2251_p11)
}
  0x79   :  { %74 = dma.hbm_to_vmem [thread:$0]  %s2909_s4, 512, %s69_s30, [#allocation6], %s2403_s2, %s2403_s2, %s2404_s27  }
  0x7a   :  { %s2255_s1 = scalar_lea.hbm %s2876_s8, 2048 }
  0x7b   :  { %p2256_p12 = scmp.ne.s32.totalorder %s2876_s8, %s2255_s1  ;;  %p2259_p13 = scmp.lt.u32.totalorder %s2255_s1, %s2876_s8 }
  0x7d   :  { %p2261_p0 = pnand %p2259_p13, %p2256_p12 }
  0x7f   :  { %2264 = shalt.err (!%p2261_p0)
}
  0x80   :  { %s2265_s24 = scalar_lea.vmem %s2611_s28, 2048  ;;  %p2270_p2 = scmp.lt.s32.totalorder %s2611_s28, %s2611_s28 }
  0x81   :  { %p2266_p1 = scmp.ne.s32.totalorder %s2611_s28, %s2265_s24  ;;  %p2271_p3 = scmp.lt.s32.totalorder %s2265_s24, %s2265_s24 }
  0x83   :  { %p2272_p4 = por %p2271_p3, %p2270_p2 }
  0x85   :  { %p2273_p5 = pnand %p2272_p4, %p2266_p1 }
  0x87   :  { %2276 = shalt.err (!%p2273_p5)
}
  0x88   :  { %102 = dma.hbm_to_vmem [thread:$0]  %s2876_s8, 2048, %s2611_s28, [#allocation9], %s2403_s2, %s2403_s2, %s2404_s27  }
  0x89   :  { %s2409_s6 = smov [#allocation13]   ;;  %s2277_s13 = scalar_lea.hbm %s2883_s15, 2048 }
  0x8a   :  { %s130_s25 = sshll.u32 %s2409_s6, 4  ;;  %p2278_p6 = scmp.ne.s32.totalorder %s2883_s15, %s2277_s13  ;;  %s131_s25 = int_to_ptr.vmem [resolvable:$true] %s130_s25 }
  0x8b   :  { %p2281_p7 = scmp.lt.u32.totalorder %s2277_s13, %s2883_s15 }
  0x8d   :  { %p2283_p8 = pnand %p2281_p7, %p2278_p6 }
  0x8f   :  { %2286 = shalt.err (!%p2283_p8)
}
  0x90   :  { %s2287_s3 = scalar_lea.vmem %s131_s25, 2048  ;;  %p2292_p10 = scmp.lt.s32.totalorder %s131_s25, %s131_s25 }
  0x91   :  { %p2288_p9 = scmp.ne.s32.totalorder %s131_s25, %s2287_s3  ;;  %p2293_p11 = scmp.lt.s32.totalorder %s2287_s3, %s2287_s3 }
  0x93   :  { %p2294_p12 = por %p2293_p11, %p2292_p10 }
  0x95   :  { %p2295_p13 = pnand %p2294_p12, %p2288_p9 }
  0x97   :  { %2298 = shalt.err (!%p2295_p13)
}
  0x98   :  { %136 = dma.hbm_to_vmem [thread:$0]  %s2883_s15, 2048, %s131_s25, [#allocation12], %s2403_s2, %s2403_s2, %s2404_s27  }
  0x99   :  { %2387 = dma.done.wait [#allocation3], 4096  }
  0x9a   :  { %2388 = vsyncadd [#allocation3], 4294963200 }
  0x9b   :  { %2389 = dma.done.wait [#allocation6], 1024  }
  0x9c   :  { %2390 = vsyncadd [#allocation6], 4294966272 }
  0x9d   :  { %2391 = dma.done.wait [#allocation9], 4096  }
  0x9e   :  { %2392 = vsyncadd [#allocation9], 4294963200 }
  0x9f   :  { %2393 = dma.done.wait [#allocation12], 4096  }
  0xa0   :  { %2394 = vsyncadd [#allocation12], 4294963200  ;;  %v180_v0 = vld [vmem:[#allocation2 + $0x80] sm:$0xff]  ;;  %v181_v1 = vld [vmem:[#allocation2 + $0x88] sm:$0xff]  ;;  %s2910_s27 = sld [smem:[#allocation27_spill]]  ;;  %v2410_v58 = vmov 0.0  }
  0xa1   :  { %v164_v2 = vld [vmem:[#allocation2] sm:$0xff]  ;;  %v1958_v3 = vpack.c.bf16 %v181_v1, %v180_v0  ;;  %v165_v4 = vld [vmem:[#allocation2 + $0x8] sm:$0xff]  ;;  %v182_v5 = vld [vmem:[#allocation2 + $0x90] sm:$0xff]  ;;  %s2911_s16 = sld [smem:[#allocation29_spill]]  ;;  %vm321_vm0 = vcmask 261120   ;;  %vm405_vm1 = vcmask 31744  }
  0xa2   :  { %v183_v6 = vld [vmem:[#allocation2 + $0x98] sm:$0xff]  ;;  %v1960_v7 = vpack.c.bf16 %v165_v4, %v164_v2  ;;  %v166_v9 = vld [vmem:[#allocation2 + $0x10] sm:$0xff]  ;;  %v184_v11 = vld [vmem:[#allocation2 + $0xa0] sm:$0xff]  ;;  %vm2411_vm2 = vmmov 0   ;;  %vm656_vm3 = vcmask 1040384   ;;  %vm898_vm4 = vcmask 25600  }
  0xa3   :  { %v1962_v8 = vpack.c.bf16 %v183_v6, %v182_v5  ;;  %v167_v10 = vld [vmem:[#allocation2 + $0x18] sm:$0xff]  ;;  %1959 = vmatprep.subr.bf16.mxu0 %v1958_v3  ;;  %v185_v12 = vld [vmem:[#allocation2 + $0xa8] sm:$0xff]  ;;  %v168_v15 = vld [vmem:[#allocation2 + $0x20] sm:$0xff]  ;;  %vm468_vm5 = vcmask 64512   ;;  %vm663_vm6 = vcmask 1043456   ;;  %s2912_s3 = sld [smem:[#allocation32_spill]] }
  0xa4   :  { %1961 = vmatpush3.bf16.msra.mxu0 %v1960_v7  ;;  %v1964_v13 = vpack.c.bf16 %v167_v10, %v166_v9  ;;  %v1966_v14 = vpack.c.bf16 %v185_v12, %v184_v11  ;;  %v169_v16 = vld [vmem:[#allocation2 + $0x28] sm:$0xff]  ;;  %v186_v17 = vld [vmem:[#allocation2 + $0xb0] sm:$0xff]  ;;  %v187_v18 = vld [vmem:[#allocation2 + $0xb8] sm:$0xff]  ;;  %vm903_vm7 = vcmask 257024   ;;  %vm1022_vm8 = vcmask 15360   ;;  %s2413_s15 = smov [#allocation15]  }
  0xa5   :  { %1963 = vmatprep.subr.bf16.mxu0 %v1962_v8  ;;  %v1968_v19 = vpack.c.bf16 %v169_v16, %v168_v15  ;;  %v1970_v20 = vpack.c.bf16 %v187_v18, %v186_v17  ;;  %v170_v21 = vld [vmem:[#allocation2 + $0x30] sm:$0xff]  ;;  %v171_v22 = vld [vmem:[#allocation2 + $0x38] sm:$0xff]  ;;  %v188_v23 = vld [vmem:[#allocation2 + $0xc0] sm:$0xff]  ;;  %vm1034_vm9 = vcmask 11264   ;;  %vm1151_vm10 = vcmask 15364   ;;  %s2414_s2 = smov [#allocation14]  }
  0xa6   :  { %v189_v24 = vld [vmem:[#allocation2 + $0xc8] sm:$0xff]  ;;  %v1972_v26 = vpack.c.bf16 %v171_v22, %v170_v21  ;;  %v172_v28 = vld [vmem:[#allocation2 + $0x40] sm:$0xff]  ;;  %v190_v30 = vld [vmem:[#allocation2 + $0xd0] sm:$0xff]  ;;  %vm1512_vm11 = vcmask 9216   ;;  %vm1277_vm12 = vcmask 1041408  }
  0xa7   :  { %v161_v25 = vld [vmem:[%s2910_s27 + $0x8] sm:$0xff]  ;;  %v1974_v27 = vpack.c.bf16 %v189_v24, %v188_v23  ;;  %v191_v31 = vld [vmem:[#allocation2 + $0xd8] sm:$0xff]  ;;  %v174_v34 = vld [vmem:[#allocation2 + $0x50] sm:$0xff] }
  0xa8   :  { %1965 = vmatpush3.bf16.msra.mxu0 %v1964_v13  ;;  %267 = vmatprep.mubr.f32.mxu0 %v161_v25  ;;  %v173_v29 = vld [vmem:[#allocation2 + $0x48] sm:$0xff]  ;;  %v1978_v33 = vpack.c.bf16 %v191_v31, %v190_v30  ;;  %v175_v35 = vld [vmem:[#allocation2 + $0x58] sm:$0xff]  ;;  %v192_v36 = vld [vmem:[#allocation2 + $0xe0] sm:$0xff] }
  0xa9   :  { %1967 = vmatprep.subr.bf16.mxu0 %v1966_v14  ;;  %v1976_v32 = vpack.c.bf16 %v173_v29, %v172_v28  ;;  %v193_v37 = vld [vmem:[#allocation2 + $0xe8] sm:$0xff]  ;;  %v1980_v38 = vpack.c.bf16 %v175_v35, %v174_v34  ;;  %v176_v40 = vld [vmem:[#allocation2 + $0x60] sm:$0xff]  ;;  %v194_v42 = vld [vmem:[#allocation2 + $0xf0] sm:$0xff] }
  0xaa   :  { %v1982_v39 = vpack.c.bf16 %v193_v37, %v192_v36  ;;  %v177_v41 = vld [vmem:[#allocation2 + $0x68] sm:$0xff]  ;;  %v195_v43 = vld [vmem:[#allocation2 + $0xf8] sm:$0xff]  ;;  %v178_v46 = vld [vmem:[#allocation2 + $0x70] sm:$0xff] }
  0xab   :  { %v1984_v44 = vpack.c.bf16 %v177_v41, %v176_v40  ;;  %v1986_v45 = vpack.c.bf16 %v195_v43, %v194_v42  ;;  %v179_v47 = vld [vmem:[#allocation2 + $0x78] sm:$0xff]  ;;  %v160_v49 = vld [vmem:[%s2910_s27] sm:$0xff]  ;;  %v162_v51 = vld [vmem:[%s2910_s27 + $0x10] sm:$0xff] }
  0xac   :  { %1969 = vmatpush3.bf16.msra.mxu0 %v1968_v19  ;;  %v1988_v48 = vpack.c.bf16 %v179_v47, %v178_v46  ;;  %v163_v50 = vld [vmem:[%s2910_s27 + $0x18] sm:$0xff]  ;;  %v278_v52 = vld [vmem:[#allocation5] sm:$0xff]  ;;  %v279_v53 = vld [vmem:[#allocation5 + $0x8] sm:$0xff]  ;;  %s1536_s27 = sshll.u32 %s2414_s2, 4  ;;  %s1537_s27 = int_to_ptr.vmem [resolvable:$true] %s1536_s27 }
  0xad   :  { %1971 = vmatprep.subr.bf16.mxu0 %v1970_v20  ;;  %v1990_v54 = vpack.c.bf16 %v279_v53, %v278_v52  ;;  %v280_v55 = vld [vmem:[#allocation5 + $0x10] sm:$0xff]  ;;  %v281_v56 = vld [vmem:[#allocation5 + $0x18] sm:$0xff]  ;;  %v1599_v61 = vld [vmem:[%s2911_s16] ss:$0 sm:$0xff] }
  0xae   :  { %v1994_v57 = vpack.c.bf16 %v281_v56, %v280_v55  ;;  %v283_v46 = vld [vmem:[#allocation7 + $0x8] sm:$0xff] }
  0xaf   :  { %1991 = vmatprep.subr.bf16.mxu1 %v1990_v54  ;;  %v288_v55 = vld [vmem:[#allocation8 + $0x8] sm:$0xff] }
  0xb0   :  { %1973 = vmatpush3.bf16.msra.mxu0 %v1972_v26  ;;  %1993 = vmatpush3.bf16.msra.mxu1 %v1990_v54  ;;  %v287_v54 = vld [vmem:[#allocation8] sm:$0xff] }
  0xb1   :  { %1975 = vmatprep.subr.bf16.mxu0 %v1974_v27  ;;  %1995 = vmatprep.subr.bf16.mxu1 %v1994_v57 }
  0xb4   :  { %1977 = vmatpush3.bf16.msra.mxu0 %v1976_v32  ;;  %1997 = vmatpush3.bf16.msra.mxu1 %v1994_v57 }
  0xb5   :  { %1979 = vmatprep.subr.bf16.mxu0 %v1978_v33  ;;  %1765 = vmatprep.subr.mxu1 %v2410_v58 }
  0xb8   :  { %1981 = vmatpush3.bf16.msra.mxu0 %v1980_v38 }
  0xb9   :  { %1983 = vmatprep.subr.bf16.mxu0 %v1982_v39 }
  0xbc   :  { %1985 = vmatpush3.bf16.msra.mxu0 %v1984_v44 }
  0xbd   :  { %1987 = vmatprep.subr.bf16.mxu0 %v1986_v45  ;;  %v282_v45 = vld [vmem:[#allocation7] sm:$0xff] }
  0xbe   :  { %v1999_v47 = vpack.c.bf16 %v283_v46, %v282_v45  ;;  %v318_v45 = vld [vmem:[#allocation10 + $0x70] sm:$0xff]  ;;  %v319_v46 = vld [vmem:[#allocation10 + $0x78] sm:$0xff] }
  0xc0   :  { %1989 = vmatpush3.bf16.msra.mxu0 %v1988_v48  ;;  %v2412_v48 = vmov 0.0|0.0  }
  0xc1   :  { %2028 = vmatprep.subr.bf16.mxu0 %v2412_v48 }
  0xc3   :  { %268 = vmatmul.mubr.f32.vlgmr.msra.gmra.mrb[0].mxu0 %v160_v49  ;;  %v284_v49 = vld [vmem:[#allocation7 + $0x10] sm:$0xff] }
  0xc4   :  { %272 = vmatprep.mubr.f32.mxu0 %v163_v50  ;;  %v285_v50 = vld [vmem:[#allocation7 + $0x18] sm:$0xff] }
  0xc7   :  { %273 = vmatmul.mubr.f32.gmra.mrb[2].mxu0 %v162_v51  ;;  %v2002_v51 = vpack.c.bf16 %v285_v50, %v284_v49  ;;  %v906_v49 = vld [vmem:[%s2878_s10] sm:$0xff]  ;;  %v907_v50 = vld [vmem:[%s2878_s10 + $0x8] sm:$0xff] }
  0xc8   :  { %1853 = vmatprep.mubr.msk.f32.mxu0 %vm2411_vm2, %v2410_v58 }
 0x196   :  { %v1651_v59 = vpop.f32.mrb[0].mxu0 }
 0x197   :  { %v1652_v60 = vpop.f32.mrb[1].mxu0 }
 0x198   :  { %v1653_v62 = vadd.f32 %v1652_v60, %v1651_v59  ;;  %v2005_v60 = vpack.c.bf16 %v288_v55, %v287_v54  ;;  %v1607_v55 = vld [vmem:[%s2875_s7] ss:$0 sm:$0xff] }
 0x19a   :  { %v1654_v63 = vpop.f32.mrb[2].mxu0  ;;  %v270_v0 = vadd.f32 %v1653_v62, %v1599_v61  ;;  %v290_v62 = vld [vmem:[#allocation8 + $0x18] sm:$0xff] }
 0x19b   :  { %v1655_v1 = vpop.f32.mrb[3].mxu0 }
 0x19c   :  { %v1656_v2 = vadd.f32 %v1655_v1, %v1654_v63  ;;  %1762 = vmatprep.mubr.msk.f32.mxu1 %vm321_vm0, %v270_v0  ;;  %v291_v1 = vld [vmem:[#allocation8 + $0x20] sm:$0xff] }
 0x19e   :  { %v2680_v3 = vadd.f32 %v1656_v2, %v1599_v61  ;;  %v289_v61 = vld [vmem:[#allocation8 + $0x10] sm:$0xff]  ;;  %v292_v2 = vld [vmem:[#allocation8 + $0x28] sm:$0xff] }
 0x1a0   :  { %1763 = vmatmul.mubr.msk.f32.vlgmr.msra.gmra.mrb[0].mxu1 %vm321_vm0, %v2680_v3 }
 0x1a1   :  { %1766 = vmatpush3.msra.mxu1 %v270_v0  ;;  %1767 = vmatprep.mubr.msk.f32.mxu1 %vm2411_vm2, %v2410_v58  ;;  %v2008_v0 = vpack.c.bf16 %v290_v62, %v289_v61  ;;  %v1608_v61 = vld [vmem:[%s2877_s9] ss:$0 sm:$0xff] }
 0x1a2   :  { %1770 = vmatprep.subr.mxu1 %v2410_v58 }
 0x273   :  { %v1764_v4 = vpop.f32.mrb[0].mxu1 }
 0x274   :  { %v394_v5 = vpop.f32.mrb[1].mxu1  ;;  %v404_v7 = vmul.f32 0.17677669, %v1764_v4  ;;  %v293_v4 = vld [vmem:[#allocation8 + $0x30] sm:$0xff] }
 0x275   :  { %v403_v6 = vmul.f32 0.17677669, %v394_v5  ;;  %v294_v5 = vld [vmem:[#allocation8 + $0x38] sm:$0xff] }
 0x276   :  { %v409_v9 = vsel %vm405_vm1, %v404_v7, -inf }
 0x277   :  { %v406_v8 = vsel %vm405_vm1, %v403_v6, -inf }
 0x278   :  { %407 = vmax.xlane.f32.xlu0 %v406_v8  ;;  %v296_v8 = vld [vmem:[#allocation8 + $0x48] sm:$0xff] }
 0x27c   :  { %410 = vmax.xlane.f32.xlu0 %v409_v9 }
 0x305   :  { %v408_v10 = vpop.xlane.xlu0 %407 }
 0x306   :  { %v412_v11 = vsub.f32 %v403_v6, %v408_v10  ;;  %v2014_v6 = vpack.c.bf16 %v294_v5, %v293_v4  ;;  %v297_v10 = vld [vmem:[#allocation8 + $0x50] sm:$0xff] }
 0x308   :  { %v414_v12 = vmul.f32 1.442695, %v412_v11  ;;  %v298_v11 = vld [vmem:[#allocation8 + $0x58] sm:$0xff] }
 0x309   :  { %v411_v13 = vpop.xlane.xlu0 %410 }
 0x30a   :  { %2133 = vpow2.f32 %v414_v12  ;;  %v413_v14 = vsub.f32 %v404_v7, %v411_v13  ;;  %v295_v7 = vld [vmem:[#allocation8 + $0x40] sm:$0xff]  ;;  %v2020_v12 = vpack.c.bf16 %v298_v11, %v297_v10 }
 0x30b   :  { %v2017_v9 = vpack.c.bf16 %v296_v8, %v295_v7  ;;  %v299_v13 = vld [vmem:[#allocation8 + $0x60] sm:$0xff] }
 0x30c   :  { %v416_v15 = vmul.f32 1.442695, %v413_v14  ;;  %v300_v14 = vld [vmem:[#allocation8 + $0x68] sm:$0xff] }
 0x30e   :  { %2135 = vpow2.f32 %v416_v15  ;;  %v2023_v15 = vpack.c.bf16 %v300_v14, %v299_v13 }
 0x314   :  { %v2134_v16 = vpop.eup %2133 }
 0x315   :  { %v418_v17 = vsel %vm405_vm1, %v2134_v16, 0.0 }
 0x316   :  { %419 = vadd.xlane.f32.xlu1 %v418_v17  ;;  %v302_v17 = vld [vmem:[#allocation8 + $0x78] sm:$0xff] }
 0x318   :  { %v2136_v18 = vpop.eup %2135 }
 0x319   :  { %v421_v19 = vsel %vm405_vm1, %v2136_v18, 0.0 }
 0x31a   :  { %422 = vadd.xlane.f32.xlu1 %v421_v19  ;;  %v304_v19 = vld [vmem:[#allocation10] sm:$0xff] }
 0x3a3   :  { %v420_v20 = vpop.xlane.xlu1 %419 }
 0x3a4   :  { %2137 = vrcp.f32 %v420_v20  ;;  %v305_v20 = vld [vmem:[#allocation10 + $0x8] sm:$0xff] }
 0x3a7   :  { %v423_v21 = vpop.xlane.xlu1 %422 }
 0x3a8   :  { %2139 = vrcp.f32 %v423_v21  ;;  %v306_v21 = vld [vmem:[#allocation10 + $0x10] sm:$0xff] }
 0x3ae   :  { %v2138_v22 = vpop.eup %2137 }
 0x3af   :  { %v426_v23 = vmul.f32 %v2138_v22, %v2134_v16  ;;  %v301_v16 = vld [vmem:[#allocation8 + $0x70] sm:$0xff]  ;;  %v2029_v22 = vpack.c.bf16 %v305_v20, %v304_v19 }
 0x3b1   :  { %436 = vxpose.xlu0.b32.start.end [1/1] (short) (narrow) %v426_v23, 8  ;;  %428 = vst.msk [vmem:[%s2885_s17] sm:$0xff] %vm405_vm1, %v426_v23  ;;  %v429_v24 = vsel %vm405_vm1, %v426_v23, -inf  ;;  %v307_v23 = vld [vmem:[#allocation10 + $0x18] sm:$0xff]  ;;  %2030 = vmatpush3.bf16.msra.mxu0 %v2029_v22 }
 0x3b2   :  { %v2140_v25 = vpop.eup %2139  ;;  %v430_v26 = vrot.slane %v429_v24, 4  ;;  %2031 = vmatprep.subr.bf16.mxu0 %v2412_v48 }
 0x3b3   :  { %v427_v27 = vmul.f32 %v2140_v25, %v2136_v18  ;;  %v2026_v18 = vpack.c.bf16 %v302_v17, %v301_v16  ;;  %v308_v25 = vld [vmem:[#allocation10 + $0x20] sm:$0xff] }
 0x3b4   :  { %v431_v28 = vmax.f32 %v429_v24, %v430_v26  ;;  %v2032_v24 = vpack.c.bf16 %v307_v23, %v306_v21  ;;  %v309_v26 = vld [vmem:[#allocation10 + $0x28] sm:$0xff] }
 0x3b5   :  { %551 = vxpose.xlu1.b32.start.end [1/1] (short) (narrow) %v427_v27, 8  ;;  %1603 = vst.msk [vmem:[%s2885_s17 + $0x8] sm:$0xff] %vm405_vm1, %v427_v27  ;;  %v544_v29 = vsel %vm405_vm1, %v427_v27, -inf  ;;  %v2035_v27 = vpack.c.bf16 %v309_v26, %v308_v25 }
 0x3b6   :  { %v432_v30 = vrot.slane %v431_v28, 2  ;;  %v545_v31 = vrot.slane %v544_v29, 4  ;;  %2033 = vmatpush3.bf16.msra.mxu0 %v2032_v24 }
 0x3b7   :  { %2034 = vmatprep.subr.bf16.mxu0 %v2412_v48 }
 0x3b8   :  { %v433_v32 = vmax.f32 %v431_v28, %v432_v30  ;;  %v546_v33 = vmax.f32 %v544_v29, %v545_v31  ;;  %v310_v28 = vld [vmem:[#allocation10 + $0x30] sm:$0xff]  ;;  %v311_v29 = vld [vmem:[#allocation10 + $0x38] sm:$0xff]  ;;  %v312_v31 = vld [vmem:[#allocation10 + $0x40] sm:$0xff] }
 0x3b9   :  { %v2038_v30 = vpack.c.bf16 %v311_v29, %v310_v28 }
 0x3ba   :  { %v547_v34 = vrot.slane %v546_v33, 2  ;;  %v434_v36 = vrot.slane %v433_v32, 1  ;;  %2036 = vmatpush3.bf16.msra.mxu0 %v2035_v27 }
 0x3bb   :  { %2037 = vmatprep.subr.bf16.mxu0 %v2412_v48 }
 0x3bc   :  { %v548_v35 = vmax.f32 %v546_v33, %v547_v34  ;;  %v435_v38 = vmax.f32 %v433_v32, %v434_v36  ;;  %v313_v32 = vld [vmem:[#allocation10 + $0x48] sm:$0xff]  ;;  %v314_v34 = vld [vmem:[#allocation10 + $0x50] sm:$0xff] }
 0x3bd   :  { %v2041_v33 = vpack.c.bf16 %v313_v32, %v312_v31 }
 0x3be   :  { %v549_v37 = vrot.slane %v548_v35, 1  ;;  %2039 = vmatpush3.bf16.msra.mxu0 %v2038_v30 }
 0x3bf   :  { %2040 = vmatprep.subr.bf16.mxu0 %v2412_v48 }
 0x3c0   :  { %v550_v39 = vmax.f32 %v548_v35, %v549_v37  ;;  %v315_v35 = vld [vmem:[#allocation10 + $0x58] sm:$0xff]  ;;  %v316_v37 = vld [vmem:[#allocation10 + $0x60] sm:$0xff] }
 0x3c1   :  { %v2044_v36 = vpack.c.bf16 %v315_v35, %v314_v34  ;;  %v910_v35 = vld [vmem:[%s2879_s11] sm:$0xff] }
 0x3c2   :  { %v657_v40 = vsel %vm656_vm3, %v435_v38, %v550_v39  ;;  %2042 = vmatpush3.bf16.msra.mxu0 %v2041_v33  ;;  %v317_v38 = vld [vmem:[#allocation10 + $0x68] sm:$0xff] }
 0x3c3   :  { %v658_v41 = vmax.f32 %v657_v40, 1e-06  ;;  %2043 = vmatprep.subr.bf16.mxu0 %v2412_v48  ;;  %v2047_v39 = vpack.c.bf16 %v317_v38, %v316_v37  ;;  %v1605_v40 = vld [vmem:[%s2912_s3] ss:$0 sm:$0xff]  ;;  %v912_v38 = vld [vmem:[%s2879_s11 + $0x10] sm:$0xff] }
 0x3c5   :  { %v659_v42 = vmin.f32 %v658_v41, 0.999999 }
 0x3c6   :  { %2045 = vmatpush3.bf16.msra.mxu0 %v2044_v36  ;;  %v911_v36 = vld [vmem:[%s2879_s11 + $0x8] sm:$0xff] }
 0x3c7   :  { %899 = vst.msk [vmem:[#allocation14] sm:$0x3] %vm898_vm4, %v659_v42  ;;  %2046 = vmatprep.subr.bf16.mxu0 %v2412_v48  ;;  %v2059_v37 = vpack.c.bf16 %v911_v36, %v910_v35  ;;  %v947_v35 = vld [vmem:[#allocation13 + $0x78] sm:$0xff] }
 0x3ca   :  { %2048 = vmatpush3.bf16.msra.mxu0 %v2047_v39  ;;  %v913_v39 = vld [vmem:[%s2879_s11 + $0x18] sm:$0xff] }
 0x3cb   :  { %2049 = vmatprep.subr.bf16.mxu0 %v2412_v48 }
 0x431   :  { %v452_v43 = vpop.trf.xlu0 }
 0x432   :  { %1768 = vmatmul.mubr.msk.f32.vlgmr.msra.gmra.mrb[2].mxu1 %vm468_vm5, %v452_v43 }
 0x433   :  { %1771 = vmatpush3.msra.mxu1 %v2680_v3  ;;  %1772 = vmatprep.mubr.msk.f32.mxu1 %vm2411_vm2, %v2410_v58  ;;  %v2011_v3 = vpack.c.bf16 %v292_v2, %v291_v1 }
 0x434   :  { %1998 = vmatprep.subr.bf16.mxu1 %v2412_v48 }
 0x435   :  { %v567_v44 = vpop.trf.xlu1 }
 0x436   :  { %1773 = vmatmul.mubr.msk.f32.vlgmr.msra.gmra.mrb[4].mxu1 %vm468_vm5, %v567_v44 }
 0x437   :  { %1783 = vmatprep.mubr.msk.f32.mxu1 %vm2411_vm2, %v2410_v58  ;;  %2000 = vmatpush3.bf16.msra.mxu1 %v1999_v47  ;;  %v2050_v47 = vpack.c.bf16 %v319_v46, %v318_v45  ;;  %v918_v45 = vld [vmem:[#allocation11 + $0x18] sm:$0xff] }
 0x438   :  { %2001 = vmatprep.subr.bf16.mxu1 %v2412_v48 }
 0x439   :  { %2051 = vmatpush3.bf16.msra.mxu0 %v2050_v47  ;;  %v919_v47 = vld [vmem:[#allocation11 + $0x20] sm:$0xff] }
 0x43a   :  { %2058 = vmatprep.subr.bf16.mxu0 %v2412_v48 }
 0x43b   :  { %2003 = vmatpush3.bf16.msra.mxu1 %v2002_v51  ;;  %v908_v51 = vld [vmem:[%s2878_s10 + $0x10] sm:$0xff] }
 0x43c   :  { %2004 = vmatprep.subr.bf16.mxu1 %v2412_v48 }
 0x505   :  { %v538_v52 = vpop.f32.mrb[2].mxu1 }
 0x506   :  { %v1769_v53 = vpop.f32.mrb[3].mxu1 }
 0x507   :  { %v909_v53 = vld [vmem:[%s2878_s10 + $0x18] sm:$0xff] }
 0x508   :  { %v2056_v54 = vpack.c.bf16 %v909_v53, %v908_v51  ;;  %v921_v51 = vld [vmem:[#allocation11 + $0x30] sm:$0xff] }
 0x509   :  { %v652_v56 = vpop.f32.mrb[4].mxu1 }
 0x50a   :  { %v661_v57 = vrot.slane %v652_v56, 4  ;;  %v1774_v59 = vpop.f32.mrb[5].mxu1 }
 0x50c   :  { %v664_v63 = vsel %vm663_vm6, %v538_v52, %v661_v57  ;;  %v2053_v52 = vpack.c.bf16 %v907_v50, %v906_v49  ;;  %v920_v49 = vld [vmem:[#allocation11 + $0x28] sm:$0xff] }
 0x50d   :  { %1784 = vmatmul.mubr.msk.f32.vlgmr.msra.gmra.mrb[6].mxu1 %vm321_vm0, %v664_v63  ;;  %v2071_v50 = vpack.c.bf16 %v920_v49, %v919_v47 }
 0x50e   :  { %2006 = vmatpush3.bf16.msra.mxu1 %v2005_v60  ;;  %1818 = vmatprep.mubr.msk.f32.mxu1 %vm2411_vm2, %v2410_v58 }
 0x50f   :  { %2007 = vmatprep.subr.bf16.mxu1 %v2412_v48 }
 0x512   :  { %2009 = vmatpush3.bf16.msra.mxu1 %v2008_v0 }
 0x513   :  { %2010 = vmatprep.subr.bf16.mxu1 %v2412_v48 }
 0x516   :  { %2012 = vmatpush3.bf16.msra.mxu1 %v2011_v3 }
 0x517   :  { %2013 = vmatprep.subr.bf16.mxu1 %v2412_v48 }
 0x51a   :  { %2015 = vmatpush3.bf16.msra.mxu1 %v2014_v6 }
 0x51b   :  { %2016 = vmatprep.subr.bf16.mxu1 %v2412_v48 }
 0x51e   :  { %2018 = vmatpush3.bf16.msra.mxu1 %v2017_v9 }
 0x51f   :  { %2019 = vmatprep.subr.bf16.mxu1 %v2412_v48 }
 0x522   :  { %2021 = vmatpush3.bf16.msra.mxu1 %v2020_v12 }
 0x523   :  { %2022 = vmatprep.subr.bf16.mxu1 %v2412_v48 }
 0x526   :  { %2024 = vmatpush3.bf16.msra.mxu1 %v2023_v15 }
 0x527   :  { %2025 = vmatprep.subr.bf16.mxu1 %v2412_v48 }
 0x52a   :  { %2027 = vmatpush3.bf16.msra.mxu1 %v2026_v18 }
 0x52b   :  { %2052 = vmatprep.subr.bf16.mxu1 %v2412_v48 }
 0x5e0   :  { %v740_v41 = vpop.f32.mrb[6].mxu1 }
 0x5e1   :  { %v741_v42 = vadd.f32 %v1605_v40, %v740_v41  ;;  %v1785_v43 = vpop.f32.mrb[7].mxu1  ;;  %v2062_v40 = vpack.c.bf16 %v913_v39, %v912_v38  ;;  %v915_v41 = vld [vmem:[#allocation11] sm:$0xff] }
 0x5e2   :  { %v917_v43 = vld [vmem:[#allocation11 + $0x10] sm:$0xff] }
 0x5e3   :  { %v744_v44 = vmax.f32 %v741_v42, 0.0  ;;  %v916_v42 = vld [vmem:[#allocation11 + $0x8] sm:$0xff]  ;;  %v2068_v46 = vpack.c.bf16 %v918_v45, %v917_v43 }
 0x5e5   :  { %1819 = vmatmul.mubr.f32.vlgmr.msra.gmra.mrb[8].mxu1 %v744_v44  ;;  %v2065_v44 = vpack.c.bf16 %v916_v42, %v915_v41 }
 0x5e6   :  { %1864 = vmatprep.mubr.msk.f32.mxu1 %vm2411_vm2, %v2410_v58  ;;  %2054 = vmatpush3.bf16.msra.mxu1 %v2053_v52  ;;  %v922_v52 = vld [vmem:[#allocation11 + $0x38] sm:$0xff] }
 0x5e7   :  { %2055 = vmatprep.subr.bf16.mxu1 %v2412_v48  ;;  %v2074_v53 = vpack.c.bf16 %v922_v52, %v921_v51 }
 0x5ea   :  { %2057 = vmatpush3.bf16.msra.mxu1 %v2056_v54  ;;  %v923_v54 = vld [vmem:[#allocation11 + $0x40] sm:$0xff] }
 0x5eb   :  { %1867 = vmatprep.subr.mxu1 %v2410_v58 }
 0x6b8   :  { %v817_v56 = vpop.f32.mrb[8].mxu1 }
 0x6b9   :  { %v818_v57 = vadd.f32 %v1607_v55, %v817_v56  ;;  %v1820_v59 = vpop.f32.mrb[9].mxu1  ;;  %v924_v55 = vld [vmem:[#allocation11 + $0x48] sm:$0xff] }
 0x6ba   :  { %v2077_v56 = vpack.c.bf16 %v924_v55, %v923_v54  ;;  %v926_v59 = vld [vmem:[#allocation11 + $0x58] sm:$0xff] }
 0x6bb   :  { %v821_v60 = vmax.f32 %v818_v57, 0.0  ;;  %v925_v57 = vld [vmem:[#allocation11 + $0x50] sm:$0xff] }
 0x6bd   :  { %1854 = vmatmul.mubr.f32.vlgmr.msra.gmra.mrb[4].mxu0 %v821_v60  ;;  %v2080_v60 = vpack.c.bf16 %v926_v59, %v925_v57 }
 0x6be   :  { %1885 = vmatprep.mubr.msk.f32.mxu0 %vm2411_vm2, %v2410_v58  ;;  %2060 = vmatpush3.bf16.msra.mxu0 %v2059_v37  ;;  %v1617_v37 = vld [vmem:[%s2882_s14] ss:$0 sm:$0xff] }
 0x6bf   :  { %2061 = vmatprep.subr.bf16.mxu0 %v2412_v48 }
 0x6c2   :  { %2063 = vmatpush3.bf16.msra.mxu0 %v2062_v40 }
 0x6c3   :  { %2088 = vmatprep.subr.bf16.mxu0 %v2412_v48 }
 0x790   :  { %v894_v62 = vpop.f32.mrb[4].mxu0 }
 0x791   :  { %v895_v63 = vadd.f32 %v1608_v61, %v894_v62  ;;  %v1855_v0 = vpop.f32.mrb[5].mxu0  ;;  %v927_v61 = vld [vmem:[#allocation11 + $0x60] sm:$0xff]  ;;  %v928_v62 = vld [vmem:[#allocation11 + $0x68] sm:$0xff] }
 0x793   :  { %1865 = vmatmul.mubr.msk.f32.vlgmr.msra.gmra.mrb[10].mxu1 %vm321_vm0, %v895_v63  ;;  %v901_v1 = vcombine.high %v895_v63, %v895_v63  ;;  %904 = vst.msk [vmem:[#allocation15] sm:$0xf] %vm903_vm7, %v895_v63  ;;  %v1195_v33 = vrot.slane %v895_v63, 4 }
 0x794   :  { %1868 = vmatpush3.msk.msra.mxu1 %vm663_vm6, %v895_v63  ;;  %1869 = vmatprep.mubr.msk.f32.mxu1 %vm2411_vm2, %v2410_v58  ;;  %v2083_v63 = vpack.c.bf16 %v928_v62, %v927_v61 }
 0x795   :  { %1872 = vmatprep.subr.mxu1 %v2410_v58  ;;  %905 = vst.msk [vmem:[#allocation15 + $0x4] sm:$0xf] %vm903_vm7, %v901_v1 }
 0x866   :  { %v1017_v2 = vpop.f32.mrb[10].mxu1 }
 0x867   :  { %v1021_v3 = vmul.f32 0.17677669, %v1017_v2  ;;  %v1866_v4 = vpop.f32.mrb[11].mxu1 }
 0x869   :  { %v1023_v5 = vsel %vm1022_vm8, %v1021_v3, -inf }
 0x86a   :  { %1024 = vmax.xlane.f32.xlu0 %v1023_v5 }
 0x8f7   :  { %v1025_v6 = vpop.xlane.xlu0 %1024 }
 0x8f8   :  { %v1026_v7 = vsub.f32 %v1021_v3, %v1025_v6  ;;  %v929_v6 = vld [vmem:[#allocation11 + $0x70] sm:$0xff] }
 0x8fa   :  { %v1027_v8 = vmul.f32 1.442695, %v1026_v7  ;;  %v930_v7 = vld [vmem:[#allocation11 + $0x78] sm:$0xff] }
 0x8fc   :  { %2141 = vpow2.f32 %v1027_v8  ;;  %v2086_v8 = vpack.c.bf16 %v930_v7, %v929_v6 }
 0x906   :  { %v2142_v9 = vpop.eup %2141 }
 0x907   :  { %v1029_v10 = vsel %vm1022_vm8, %v2142_v9, 0.0 }
 0x908   :  { %1030 = vadd.xlane.f32.xlu1 %v1029_v10  ;;  %v933_v10 = vld [vmem:[#allocation13 + $0x8] sm:$0xff] }
 0x995   :  { %v1031_v11 = vpop.xlane.xlu1 %1030 }
 0x996   :  { %2143 = vrcp.f32 %v1031_v11  ;;  %v934_v11 = vld [vmem:[#allocation13 + $0x10] sm:$0xff] }
 0x9a0   :  { %v2144_v12 = vpop.eup %2143 }
 0x9a1   :  { %v1033_v13 = vmul.f32 %v2144_v12, %v2142_v9  ;;  %v932_v9 = vld [vmem:[#allocation13] sm:$0xff] }
 0x9a2   :  { %v2089_v12 = vpack.c.bf16 %v933_v10, %v932_v9 }
 0x9a3   :  { %1043 = vxpose.xlu0.b32.start.end [1/1] (short) (narrow) %v1033_v13, 8  ;;  %v1161_v14 = vrot.slane %v1033_v13, 4  ;;  %1035 = vst.msk [vmem:[%s2888_s20] sm:$0xf] %vm1034_vm9, %v1033_v13  ;;  %v1036_v15 = vsel %vm1034_vm9, %v1033_v13, -inf  ;;  %v1153_v16 = vsel %vm1151_vm10, %v1033_v13, -inf }
 0x9a4   :  { %1612 = vst.msk [vmem:[%s2888_s20] sm:$0xf0] %vm1151_vm10, %v1033_v13  ;;  %v1037_v17 = vrot.slane %v1036_v15, 4  ;;  %v1154_v18 = vrot.slane %v1153_v16, 4  ;;  %v935_v13 = vld [vmem:[#allocation13 + $0x18] sm:$0xff] }
 0x9a5   :  { %1163 = vxpose.xlu1.b32.start.end [1/1] (short) (narrow) %v1161_v14, 8  ;;  %v2092_v14 = vpack.c.bf16 %v935_v13, %v934_v11 }
 0x9a6   :  { %v1038_v19 = vmax.f32 %v1036_v15, %v1037_v17  ;;  %v1155_v20 = vmax.f32 %v1153_v16, %v1154_v18  ;;  %v936_v15 = vld [vmem:[#allocation13 + $0x20] sm:$0xff]  ;;  %v937_v16 = vld [vmem:[#allocation13 + $0x28] sm:$0xff]  ;;  %v939_v18 = vld [vmem:[#allocation13 + $0x38] sm:$0xff] }
 0x9a7   :  { %v2095_v17 = vpack.c.bf16 %v937_v16, %v936_v15 }
 0x9a8   :  { %v1039_v21 = vrot.slane %v1038_v19, 2  ;;  %v1156_v22 = vrot.slane %v1155_v20, 2 }
 0x9aa   :  { %v1040_v23 = vmax.f32 %v1038_v19, %v1039_v21  ;;  %v1157_v24 = vmax.f32 %v1155_v20, %v1156_v22  ;;  %v940_v20 = vld [vmem:[#allocation13 + $0x40] sm:$0xff]  ;;  %v941_v21 = vld [vmem:[#allocation13 + $0x48] sm:$0xff] }
 0x9ab   :  { %v2101_v22 = vpack.c.bf16 %v941_v21, %v940_v20 }
 0x9ac   :  { %v1041_v25 = vrot.slane %v1040_v23, 1  ;;  %v1158_v26 = vrot.slane %v1157_v24, 1 }
 0x9ae   :  { %v1042_v27 = vmax.f32 %v1040_v23, %v1041_v25  ;;  %v1159_v28 = vmax.f32 %v1157_v24, %v1158_v26  ;;  %v942_v23 = vld [vmem:[#allocation13 + $0x50] sm:$0xff]  ;;  %v943_v24 = vld [vmem:[#allocation13 + $0x58] sm:$0xff]  ;;  %v944_v26 = vld [vmem:[#allocation13 + $0x60] sm:$0xff] }
 0x9af   :  { %v2104_v25 = vpack.c.bf16 %v943_v24, %v942_v23 }
 0x9b0   :  { %v1271_v29 = vsel %vm656_vm3, %v1042_v27, %v1159_v28  ;;  %v945_v27 = vld [vmem:[#allocation13 + $0x68] sm:$0xff] }
 0x9b1   :  { %v1272_v30 = vmax.f32 %v1271_v29, 1e-06  ;;  %v2107_v28 = vpack.c.bf16 %v945_v27, %v944_v26  ;;  %v1615_v29 = vld [vmem:[%s2880_s12] ss:$0 sm:$0xff]  ;;  %s1545_s12 = sshll.u32 %s2413_s15, 4  ;;  %s1546_s12 = int_to_ptr.vmem [resolvable:$true] %s1545_s12 }
 0x9b2   :  { %s2299_s5 = scalar_lea.vmem %s1546_s12, 128  ;;  %p2304_p1 = scmp.lt.s32.totalorder %s1546_s12, %s1546_s12 }
 0x9b3   :  { %v1273_v31 = vmin.f32 %v1272_v30, 0.999999  ;;  %p2300_p0 = scmp.ne.s32.totalorder %s1546_s12, %s2299_s5  ;;  %p2305_p2 = scmp.lt.s32.totalorder %s2299_s5, %s2299_s5 }
 0x9b5   :  { %1513 = vst.msk [vmem:[#allocation17] sm:$0x3] %vm1512_vm11, %v1273_v31  ;;  %p2306_p3 = por %p2305_p2, %p2304_p1 }
 0x9b7   :  { %p2307_p4 = pnand %p2306_p3, %p2300_p0 }
 0xa23   :  { %v1059_v32 = vpop.trf.xlu0 }
 0xa24   :  { %1870 = vmatmul.mubr.msk.f32.vlgmr.msra.gmra.mrb[12].mxu1 %vm405_vm1, %v1059_v32 }
 0xa25   :  { %1873 = vmatpush3.msk.msra.mxu1 %vm663_vm6, %v1195_v33  ;;  %1874 = vmatprep.mubr.msk.f32.mxu1 %vm2411_vm2, %v2410_v58  ;;  %v1179_v34 = vpop.trf.xlu1 }
 0xa26   :  { %2064 = vmatprep.subr.bf16.mxu1 %v2412_v48 }
 0xa28   :  { %1875 = vmatmul.mubr.msk.f32.vlgmr.msra.gmra.mrb[14].mxu1 %vm405_vm1, %v1179_v34  ;;  %v946_v34 = vld [vmem:[#allocation13 + $0x70] sm:$0xff] }
 0xa29   :  { %1920 = vmatprep.mubr.msk.f32.mxu1 %vm2411_vm2, %v2410_v58  ;;  %2066 = vmatpush3.bf16.msra.mxu1 %v2065_v44  ;;  %v2110_v36 = vpack.c.bf16 %v947_v35, %v946_v34 }
 0xa2a   :  { %2067 = vmatprep.subr.bf16.mxu1 %v2412_v48 }
 0xa2d   :  { %2069 = vmatpush3.bf16.msra.mxu1 %v2068_v46 }
 0xa2e   :  { %2070 = vmatprep.subr.bf16.mxu1 %v2412_v48 }
 0xa31   :  { %2072 = vmatpush3.bf16.msra.mxu1 %v2071_v50 }
 0xa32   :  { %2073 = vmatprep.subr.bf16.mxu1 %v2412_v48 }
 0xa35   :  { %2075 = vmatpush3.bf16.msra.mxu1 %v2074_v53 }
 0xa36   :  { %2076 = vmatprep.subr.bf16.mxu1 %v2412_v48 }
 0xa39   :  { %2078 = vmatpush3.bf16.msra.mxu1 %v2077_v56 }
 0xa3a   :  { %2079 = vmatprep.subr.bf16.mxu1 %v2412_v48 }
 0xa3d   :  { %2081 = vmatpush3.bf16.msra.mxu1 %v2080_v60 }
 0xa3e   :  { %2082 = vmatprep.subr.bf16.mxu1 %v2412_v48 }
 0xa41   :  { %2084 = vmatpush3.bf16.msra.mxu1 %v2083_v63 }
 0xa42   :  { %2085 = vmatprep.subr.bf16.mxu1 %v2412_v48 }
 0xa45   :  { %2087 = vmatpush3.bf16.msra.mxu1 %v2086_v8 }
 0xaf7   :  { %v1146_v0 = vpop.f32.mrb[12].mxu1 }
 0xaf8   :  { %v1871_v1 = vpop.f32.mrb[13].mxu1 }
 0xafb   :  { %v1267_v2 = vpop.f32.mrb[14].mxu1 }
 0xafc   :  { %v1275_v3 = vrot.slane %v1267_v2, 6  ;;  %v1876_v4 = vpop.f32.mrb[15].mxu1 }
 0xafe   :  { %v1278_v5 = vsel %vm1277_vm12, %v1146_v0, %v1275_v3 }
 0xaff   :  { %1886 = vmatmul.mubr.msk.f32.vlgmr.msra.gmra.mrb[6].mxu0 %vm321_vm0, %v1278_v5 }
 0xb00   :  { %1955 = vmatprep.mubr.msk.f32.mxu0 %vm2411_vm2, %v2410_v58  ;;  %2090 = vmatpush3.bf16.msra.mxu0 %v2089_v12  ;;  %v938_v58 = vld [vmem:[#allocation13 + $0x30] sm:$0xff] }
 0xb01   :  { %2091 = vmatprep.subr.bf16.mxu0 %v2412_v48  ;;  %v2098_v19 = vpack.c.bf16 %v939_v18, %v938_v58 }
 0xb04   :  { %2093 = vmatpush3.bf16.msra.mxu0 %v2092_v14 }
 0xb05   :  { %2094 = vmatprep.subr.bf16.mxu0 %v2412_v48 }
 0xb08   :  { %2096 = vmatpush3.bf16.msra.mxu0 %v2095_v17 }
 0xb09   :  { %2097 = vmatprep.subr.bf16.mxu0 %v2412_v48 }
 0xb0c   :  { %2099 = vmatpush3.bf16.msra.mxu0 %v2098_v19 }
 0xb0d   :  { %2100 = vmatprep.subr.bf16.mxu0 %v2412_v48 }
 0xb10   :  { %2102 = vmatpush3.bf16.msra.mxu0 %v2101_v22 }
 0xb11   :  { %2103 = vmatprep.subr.bf16.mxu0 %v2412_v48 }
 0xb14   :  { %2105 = vmatpush3.bf16.msra.mxu0 %v2104_v25 }
 0xb15   :  { %2106 = vmatprep.subr.bf16.mxu0 %v2412_v48 }
 0xb18   :  { %2108 = vmatpush3.bf16.msra.mxu0 %v2107_v28 }
 0xb19   :  { %2109 = vmatprep.subr.bf16.mxu0 %v2412_v48 }
 0xb1c   :  { %2111 = vmatpush3.bf16.msra.mxu0 %v2110_v36 }
 0xbd2   :  { %v1354_v30 = vpop.f32.mrb[6].mxu0 }
 0xbd3   :  { %v1355_v31 = vadd.f32 %v1615_v29, %v1354_v30  ;;  %v1887_v32 = vpop.f32.mrb[7].mxu0 }
 0xbd5   :  { %v1358_v33 = vmax.f32 %v1355_v31, 0.0 }
 0xbd7   :  { %1921 = vmatmul.mubr.f32.vlgmr.msra.gmra.mrb[16].mxu1 %v1358_v33 }
 0xcaa   :  { %v1431_v38 = vpop.f32.mrb[16].mxu1 }
 0xcab   :  { %v1432_v39 = vadd.f32 %v1617_v37, %v1431_v38  ;;  %v1922_v48 = vpop.f32.mrb[17].mxu1 }
 0xcad   :  { %v1435_v40 = vmax.f32 %v1432_v39, 0.0 }
 0xcaf   :  { %1956 = vmatmul.mubr.f32.vlgmr.msra.gmra.mrb[8].mxu0 %v1435_v40 }
 0xcb0   :  { %2310 = shalt.err (!%p2307_p4)
}
 0xcb1   :  { %s2311_s14 = scalar_lea.hbm %s2887_s19, 128 }
 0xcb2   :  { %p2312_p5 = scmp.ne.s32.totalorder %s2887_s19, %s2311_s14  ;;  %p2315_p6 = scmp.lt.u32.totalorder %s2311_s14, %s2887_s19 }
 0xcb4   :  { %p2317_p7 = pnand %p2315_p6, %p2312_p5 }
 0xcb6   :  { %2320 = shalt.err (!%p2317_p7)
}
 0xcb7   :  { %s2415_s7 = smov 64   ;;  %s2416_s9 = smov 4  }
 0xcb8   :  { %1551 = dma.vmem_to_hbm [thread:$0]  %s1546_s12, 128, %s2887_s19, [#allocation16], %s2415_s7, %s2415_s7, %s2416_s9  }
 0xcb9   :  { %s2321_s20 = scalar_lea.vmem %s1537_s27, 32  ;;  %p2326_p9 = scmp.lt.s32.totalorder %s1537_s27, %s1537_s27 }
 0xcba   :  { %p2322_p8 = scmp.ne.s32.totalorder %s1537_s27, %s2321_s20  ;;  %p2327_p10 = scmp.lt.s32.totalorder %s2321_s20, %s2321_s20 }
 0xcbc   :  { %p2328_p11 = por %p2327_p10, %p2326_p9 }
 0xcbe   :  { %p2329_p12 = pnand %p2328_p11, %p2322_p8 }
 0xcc0   :  { %2332 = shalt.err (!%p2329_p12)
}
 0xcc1   :  { %s2333_s29 = scalar_lea.hbm %s2886_s18, 32 }
 0xcc2   :  { %p2334_p13 = scmp.ne.s32.totalorder %s2886_s18, %s2333_s29  ;;  %p2337_p0 = scmp.lt.u32.totalorder %s2333_s29, %s2886_s18 }
 0xcc4   :  { %p2339_p1 = pnand %p2337_p0, %p2334_p13 }
 0xcc6   :  { %2342 = shalt.err (!%p2339_p1)
}
 0xcc7   :  { %1539 = dma.vmem_to_hbm [thread:$0]  %s1537_s27, 32, %s2886_s18, [#allocation4]  }
 0xcc8   :  { %s2417_s3 = smov [#allocation17]  }
 0xcc9   :  { %s1560_s8 = sshll.u32 %s2417_s3, 4  ;;  %s1561_s8 = int_to_ptr.vmem [resolvable:$true] %s1560_s8 }
 0xcca   :  { %s2343_s28 = scalar_lea.vmem %s1561_s8, 32  ;;  %p2348_p3 = scmp.lt.s32.totalorder %s1561_s8, %s1561_s8 }
 0xccb   :  { %p2344_p2 = scmp.ne.s32.totalorder %s1561_s8, %s2343_s28  ;;  %p2349_p4 = scmp.lt.s32.totalorder %s2343_s28, %s2343_s28 }
 0xccd   :  { %p2350_p5 = por %p2349_p4, %p2348_p3 }
 0xccf   :  { %p2351_p6 = pnand %p2350_p5, %p2344_p2 }
 0xcd1   :  { %2354 = shalt.err (!%p2351_p6)
}
 0xcd2   :  { %s2355_s2 = scalar_lea.hbm %s2889_s21, 32 }
 0xcd3   :  { %p2356_p7 = scmp.ne.s32.totalorder %s2889_s21, %s2355_s2  ;;  %p2359_p8 = scmp.lt.u32.totalorder %s2355_s2, %s2889_s21 }
 0xcd5   :  { %p2361_p9 = pnand %p2359_p8, %p2356_p7 }
 0xcd7   :  { %2364 = shalt.err (!%p2361_p9)
}
 0xcd8   :  { %1563 = dma.vmem_to_hbm [thread:$0]  %s1561_s8, 32, %s2889_s21, [#allocation16]   ;;  %v2418_v41 = vmov 1983009808   ;;  %v1518_v43 = vlaneseq  ;;  %vm1525_vm13 = vcmask 254976  }
 0xcd9   :  { %v1516_v42 = vunpack.c.l.s4 %v2418_v41  ;;  %s2913_s10 = sld [smem:[#allocation34_spill]]  ;;  %s2419_s6 = smov [#allocation18]  }
 0xcda   :  { %v1519_v45 = vshrl.u32 %v1518_v43, 7  ;;  %s1569_s7 = sshll.u32 %s2419_s6, 4  ;;  %s1570_s7 = int_to_ptr.vmem [resolvable:$true] %s1569_s7 }
 0xcdb   :  { %v1517_v44 = vunpack.c.0.s8 %v1516_v42  ;;  %s2365_s21 = scalar_lea.vmem %s1570_s7, 64  ;;  %p2370_p11 = scmp.lt.s32.totalorder %s1570_s7, %s1570_s7 }
 0xcdc   :  { %p2366_p10 = scmp.ne.s32.totalorder %s1570_s7, %s2365_s21  ;;  %p2371_p12 = scmp.lt.s32.totalorder %s2365_s21, %s2365_s21 }
 0xcdd   :  { %v1520_v47 = vsub.s32 %v1517_v44, %v1519_v45 }
 0xcde   :  { %p2372_p13 = por %p2371_p12, %p2370_p11 }
 0xcdf   :  { %v1618_v46 = vld [vmem:[%s2913_s10] ss:$0 sm:$0xff] }
 0xce0   :  { %p2373_p0 = pnand %p2372_p13, %p2366_p10 }
 0xd82   :  { %v1508_v49 = vpop.f32.mrb[8].mxu0 }
 0xd83   :  { %v1509_v50 = vadd.f32 %v1618_v46, %v1508_v49  ;;  %v1957_v51 = vpop.f32.mrb[9].mxu0 }
 0xd85   :  { %v1521_v52 = vrot.slane %v1509_v50, %v1520_v47 }
 0xd87   :  { %v1522_v53 = vcombine.high %v1521_v52, %v1521_v52  ;;  %1526 = vst.msk [vmem:[#allocation18] sm:$0x3] %vm1525_vm13, %v1521_v52 }
 0xd89   :  { %1527 = vst.msk [vmem:[#allocation18 + $0x2] sm:$0x3] %vm1525_vm13, %v1522_v53 }
 0xd8a   :  { %2376 = shalt.err (!%p2373_p0)
}
 0xd8b   :  { %s2914_s0 = sld [smem:[#allocation35_spill]] }
 0xd91   :  { %s2377_s20 = scalar_lea.hbm %s2914_s0, 64 }
 0xd92   :  { %p2378_p1 = scmp.ne.s32.totalorder %s2914_s0, %s2377_s20  ;;  %p2381_p2 = scmp.lt.u32.totalorder %s2377_s20, %s2914_s0 }
 0xd94   :  { %p2383_p3 = pnand %p2381_p2, %p2378_p1 }
 0xd96   :  { %2386 = shalt.err (!%p2383_p3)
}
 0xd97   :  { %s2420_s1 = smov 32   ;;  %s2421_s17 = smov 2  }
 0xd98   :  { %1575 = dma.vmem_to_hbm [thread:$0]  %s1570_s7, 64, %s2914_s0, [#allocation19], %s2420_s1, %s2420_s1, %s2421_s17  }
 0xd99   :  { %2395 = dma.done.wait [#allocation4], 32  }
 0xd9a   :  { %2396 = vsyncadd [#allocation4], 4294967264 }
 0xd9b   :  { %2397 = dma.done.wait [#allocation16], 160  }
 0xd9c   :  { %2398 = vsyncadd [#allocation16], 4294967136 }
 0xd9d   :  { %2399 = dma.done.wait [#allocation19], 64  }
 0xd9e   :  { %2400 = vsyncadd [#allocation19], 4294967232 }
 0xd9f   :  { %1592 = vsyncpa [#allocation3], 1 }
 0xda0   :  { %1593 = vsyncpa [#allocation6], 1 }
 0xda1   :  { %1594 = vsyncpa [#allocation9], 1 }
 0xda2   :  { %1595 = vsyncpa [#allocation12], 1 }
 0xda3   :  { %1596 = vsyncpa [#allocation4], 1 }
 0xda4   :  { %1597 = vsyncpa [#allocation16], 1 }
 0xda5   :  { %1598 = vsyncpa [#allocation19], 1 }

</bundles_post_ra>
